<compile_context>
chip_gen: v6e
topology: v6e:2x2x1
jax: 0.10.0
libtpu: 0.0.40
codegen_flags: <defaults>
</compile_context>

<pallas_src>
import functools

import numpy as np
import jax
import jax.numpy as jnp
from jax.experimental import pallas as pl
from jax.experimental.pallas import tpu as pltpu

MXU_DTYPE = jnp.bfloat16     # MXU operand dtype (f32 accumulation everywhere)
_EPS = 1e-5


# ---------------------------------------------------------------------------
# Static (numpy) tables: bilinear align_corners=True interpolation operator,
# band mask, interior mask.
# ---------------------------------------------------------------------------
def _interp_matrix_np(n_in, n_out):
    A = np.zeros((n_out, n_in), dtype=np.float32)
    if n_in == 1 or n_out == 1:
        A[:, 0] = 1.0
        return A
    scale = (n_in - 1) / (n_out - 1)
    for o in range(n_out):
        s = o * scale
        i0 = min(int(np.floor(s)), n_in - 1)
        i1 = min(i0 + 1, n_in - 1)
        f = s - i0
        A[o, i0] += 1.0 - f
        A[o, i1] += f
    return A


@functools.lru_cache(maxsize=None)
def _static_tables(hin, win):
    """Returns (B^T, band_mask, interior_mask) as numpy arrays.

    Padded-flat layout: Lp = (h+2)*(w+2) + 2 lanes = zero-padded plane plus two
    trailing zero lanes so every tap slice [dy*wp+dx, dy*wp+dx+Lb) is in bounds.
    B^T: (hin*win, Lp) flattened low-res plane -> padded-flat 2x upsampled plane.
    band_mask: (1, Lb) 1.0 on the w valid columns of each band row.
    interior_mask: (1, Lp) 1.0 on the interior of the padded plane.
    """
    h, w = 2 * hin, 2 * win
    wp = w + 2
    Lb = h * wp
    Lp = (h + 2) * wp + 2
    ah = _interp_matrix_np(hin, h)          # (h, hin)
    aw = _interp_matrix_np(win, w)          # (w, win)
    B = np.zeros((Lp, hin * win), dtype=np.float32)
    for y in range(h):
        for x in range(w):
            B[(y + 1) * wp + (x + 1), :] = np.kron(ah[y], aw[x])
    band = np.zeros((h, wp), dtype=np.float32)
    band[:, :w] = 1.0
    inter = np.zeros(Lp, dtype=np.float32)
    inter[: (h + 2) * wp].reshape(h + 2, wp)[1:h + 1, 1:w + 1] = 1.0
    return B.T.copy(), band.reshape(1, Lb), inter.reshape(1, Lp)


# ---------------------------------------------------------------------------
# Shared conv core: bf16 taps from padded-flat activations of nb images,
# concatenated along the lane axis, one K = 9*cin MXU matmul, band masking.
# ---------------------------------------------------------------------------
def _taps_matmul(acts, w_ref, bmask_ref, *, h, w):
    wp = w + 2
    lb = h * wp
    offs = [dy * wp + dx for dy in range(3) for dx in range(3)]
    # (9*cin, nb*Lb) bf16: tap index on sublanes, images concatenated on lanes.
    taps = jnp.concatenate(
        [jnp.concatenate([a[:, off:off + lb] for a in acts], axis=1)
         for off in offs],
        axis=0)
    acc = jnp.dot(w_ref[...], taps, preferred_element_type=jnp.float32)
    return acc * bmask_ref[...]              # zero the 2 garbage columns / row


def _conv1_kernel(x1_ref, xl_ref, bt_ref, w_ref, bmask_ref,
                  z_ref, s_ref, q_ref, *, nb, h, w):
    wp = w + 2
    lb = h * wp
    cout = w_ref.shape[0]
    acts = []
    for j in range(nb):
        # Fused bilinear 2x upsample (+ zero pad ring) of the low-res branch,
        # cast to bf16 immediately (keeps act/taps bf16 end-to-end).
        up = jnp.dot(xl_ref[j], bt_ref[...],
                     preferred_element_type=jnp.float32).astype(MXU_DTYPE)
        # torch.cat([x1, up(x)], dim=1) exists only in VMEM, in bf16.
        acts.append(jnp.concatenate([x1_ref[j], up], axis=0))   # (cin, Lp)
    acc = _taps_matmul(acts, w_ref, bmask_ref, h=h, w=w)        # (cout, nb*Lb)
    # Per-grid-step partial BN statistics (masked columns contribute zero).
    s_ref[0] = jnp.sum(acc, axis=1, keepdims=True)
    q_ref[0] = jnp.sum(acc * acc, axis=1, keepdims=True)
    # Emit z1 directly in padded-flat bf16: band at lane offset wp+1; the two
    # masked columns per row become the pad ring; edges zeroed here.
    zpre = jnp.zeros((cout, wp + 1), MXU_DTYPE)
    zpost = jnp.zeros((cout, w + 3), MXU_DTYPE)
    for j in range(nb):
        band = acc[:, j * lb:(j + 1) * lb].astype(MXU_DTYPE)
        z_ref[j] = jnp.concatenate([zpre, band, zpost], axis=1)


def _conv2_kernel(z1_ref, sc_ref, sh_ref, imask_ref, w_ref, bmask_ref,
                  z_ref, s_ref, q_ref, *, nb, h, w):
    wp = w + 2
    lb = h * wp
    acts = []
    for j in range(nb):
        # BN1 (batch-stats scale/shift) + ReLU fused on load (f32 math);
        # interior mask keeps the pad ring exactly zero after the affine;
        # cast to bf16 before tap slicing.
        a = jnp.maximum(z1_ref[j].astype(jnp.float32) * sc_ref[...]
                        + sh_ref[...], 0.0)
        acts.append((a * imask_ref[...]).astype(MXU_DTYPE))     # (cin, Lp)
    acc = _taps_matmul(acts, w_ref, bmask_ref, h=h, w=w)        # (cout, nb*Lb)
    s_ref[0] = jnp.sum(acc, axis=1, keepdims=True)
    q_ref[0] = jnp.sum(acc * acc, axis=1, keepdims=True)
    # z2 leaves in bf16 band layout; BN2 + ReLU + crop are fused by XLA outside.
    for j in range(nb):
        z_ref[j] = acc[:, j * lb:(j + 1) * lb].astype(MXU_DTYPE)


# ---------------------------------------------------------------------------
# pallas_call builders (grid over batch blocks; every axis independent).
# ---------------------------------------------------------------------------
def _compiler_params():
    # Generation-aware VMEM limit (v7x has only 64 MiB physical per core).
    vmem = 32 * 1024 * 1024
    try:
        cap = getattr(pltpu.get_tpu_info(), "vmem_capacity_bytes", None)
        if cap:
            vmem = min(int(cap) * 3 // 4, 100 * 1024 * 1024)
    except Exception:
        pass
    return pltpu.CompilerParams(dimension_semantics=("parallel",),
                                vmem_limit_bytes=vmem)


def _conv1_call(n, nb, c_skip, c_up, cout, hin, win):
    h, w = 2 * hin, 2 * win
    wp = w + 2
    Lb, Lp = h * wp, (h + 2) * wp + 2
    cin = c_skip + c_up
    nblk = n // nb
    kernel = functools.partial(_conv1_kernel, nb=nb, h=h, w=w)
    return pl.pallas_call(
        kernel,
        out_shape=(jax.ShapeDtypeStruct((n, cout, Lp), MXU_DTYPE),
                   jax.ShapeDtypeStruct((nblk, cout, 1), jnp.float32),
                   jax.ShapeDtypeStruct((nblk, cout, 1), jnp.float32)),
        grid=(nblk,),
        in_specs=[
            pl.BlockSpec((nb, c_skip, Lp), lambda i: (i, 0, 0)),        # skip, padded-flat bf16
            pl.BlockSpec((nb, c_up, hin * win), lambda i: (i, 0, 0)),   # low-res x, flat bf16
            pl.BlockSpec((hin * win, Lp), lambda i: (0, 0)),            # upsample+pad operator
            pl.BlockSpec((cout, 9 * cin), lambda i: (0, 0)),            # conv1 weights
            pl.BlockSpec((1, nb * Lb), lambda i: (0, 0)),               # band mask (nb-tiled)
        ],
        out_specs=(
            pl.BlockSpec((nb, cout, Lp), lambda i: (i, 0, 0)),          # z1 padded-flat bf16
            pl.BlockSpec((1, cout, 1), lambda i: (i, 0, 0)),            # partial sum
            pl.BlockSpec((1, cout, 1), lambda i: (i, 0, 0)),            # partial sumsq
        ),
        compiler_params=_compiler_params(),
    )


def _conv2_call(n, nb, cin, cout, h, w):
    wp = w + 2
    Lb, Lp = h * wp, (h + 2) * wp + 2
    nblk = n // nb
    kernel = functools.partial(_conv2_kernel, nb=nb, h=h, w=w)
    return pl.pallas_call(
        kernel,
        out_shape=(jax.ShapeDtypeStruct((n, cout, Lb), MXU_DTYPE),
                   jax.ShapeDtypeStruct((nblk, cout, 1), jnp.float32),
                   jax.ShapeDtypeStruct((nblk, cout, 1), jnp.float32)),
        grid=(nblk,),
        in_specs=[
            pl.BlockSpec((nb, cin, Lp), lambda i: (i, 0, 0)),   # z1 padded-flat bf16
            pl.BlockSpec((cin, 1), lambda i: (0, 0)),           # BN1 scale
            pl.BlockSpec((cin, 1), lambda i: (0, 0)),           # BN1 shift
            pl.BlockSpec((1, Lp), lambda i: (0, 0)),            # interior mask
            pl.BlockSpec((cout, 9 * cin), lambda i: (0, 0)),    # conv2 weights
            pl.BlockSpec((1, nb * Lb), lambda i: (0, 0)),       # band mask (nb-tiled)
        ],
        out_specs=(
            pl.BlockSpec((nb, cout, Lb), lambda i: (i, 0, 0)),  # z2 band layout bf16
            pl.BlockSpec((1, cout, 1), lambda i: (i, 0, 0)),
            pl.BlockSpec((1, cout, 1), lambda i: (i, 0, 0)),
        ),
        compiler_params=_compiler_params(),
    )


def _pick_nb(n):
    for cand in (4, 2, 1):
        if n % cand == 0:
            return cand
    return 1


# ---------------------------------------------------------------------------
# Forward pass (matches PyTorch Up.forward semantics, NCHW in / NCHW out).
# ---------------------------------------------------------------------------
@jax.jit
def up_forward(x, x1, params):
    n, c_up, hin, win = x.shape
    _, c_skip, h, w = x1.shape
    assert h == 2 * hin and w == 2 * win
    wp = w + 2
    L = (h + 2) * wp
    Lp = L + 2
    cin = c_skip + c_up
    cout = params["w1"].shape[0]
    nb = _pick_nb(n)

    bt_np, band_np, inter_np = _static_tables(hin, win)
    bt = jnp.asarray(bt_np, MXU_DTYPE)                       # (hin*win, Lp)
    band_nb = jnp.asarray(np.tile(band_np, (1, nb)))         # (1, nb*Lb)
    inter = jnp.asarray(inter_np)                            # (1, Lp)

    # One fused layout+cast pass over the skip tensor (the bf16 cast is needed
    # anyway); the low-res branch is just flatten+cast.
    x1_pf = jnp.pad(x1, ((0, 0), (0, 0), (1, 1), (1, 1))).reshape(n, c_skip, L)
    x1_pf = jnp.pad(x1_pf, ((0, 0), (0, 0), (0, 2))).astype(MXU_DTYPE)
    x_lf = x.reshape(n, c_up, hin * win).astype(MXU_DTYPE)

    # Conv biases dropped: exactly cancelled by training-mode BatchNorm.
    w1f = jnp.transpose(params["w1"], (0, 2, 3, 1)).reshape(cout, 9 * cin) \
              .astype(MXU_DTYPE)
    w2f = jnp.transpose(params["w2"], (0, 2, 3, 1)).reshape(cout, 9 * cout) \
              .astype(MXU_DTYPE)

    # --- conv1: upsample + concat + 3x3 conv + BN partial stats; z1 comes out
    #     already in padded-flat bf16 (no XLA re-pad pass between the convs) ---
    z1, s1, q1 = _conv1_call(n, nb, c_skip, c_up, cout, hin, win)(
        x1_pf, x_lf, bt, w1f, band_nb)
    cnt = float(n * h * w)
    mean1 = jnp.sum(s1, axis=0)[:, 0] / cnt
    var1 = jnp.maximum(jnp.sum(q1, axis=0)[:, 0] / cnt - mean1 * mean1, 0.0)
    sc1 = params["g1"] / jnp.sqrt(var1 + _EPS)
    sh1 = params["bt1"] - mean1 * sc1

    # --- conv2: BN1 + ReLU fused on input, 3x3 conv + BN partial stats ---
    z2, s2, q2 = _conv2_call(n, nb, cout, cout, h, w)(
        z1, sc1.reshape(cout, 1), sh1.reshape(cout, 1), inter, w2f, band_nb)
    mean2 = jnp.sum(s2, axis=0)[:, 0] / cnt
    var2 = jnp.maximum(jnp.sum(q2, axis=0)[:, 0] / cnt - mean2 * mean2, 0.0)
    sc2 = params["g2"] / jnp.sqrt(var2 + _EPS)
    sh2 = params["bt2"] - mean2 * sc2

    # --- final BN2 + ReLU + crop: ONE fused XLA elementwise pass over z2 ---
    y = jnp.maximum(z2.astype(jnp.float32) * sc2[None, :, None]
                    + sh2[None, :, None], 0.0)
    return y.reshape(n, cout, h, wp)[:, :, :, :w]


# ---------------------------------------------------------------------------
# Pure-JAX (f32, XLA conv, with bias) reference for validation.
# ---------------------------------------------------------------------------
def reference_up(x, x1, params, eps=_EPS):
    hin, win = x.shape[2], x.shape[3]
    a_h = jnp.asarray(_interp_matrix_np(hin, 2 * hin))
    a_w = jnp.asarray(_interp_matrix_np(win, 2 * win))
    xu = jnp.einsum("oh,nchw->ncow", a_h, x)
    xu = jnp.einsum("pw,ncow->ncop", a_w, xu)
    x2 = jnp.concatenate([x1, xu], axis=1)

    def cbr(inp, wgt, b, g, bt):
        z = jax.lax.conv_general_dilated(
            inp, wgt, window_strides=(1, 1), padding=((1, 1), (1, 1)),
            dimension_numbers=("NCHW", "OIHW", "NCHW"),
            preferred_element_type=jnp.float32) + b[None, :, None, None]
        mean = jnp.mean(z, axis=(0, 2, 3), keepdims=True)
        var = jnp.mean((z - mean) ** 2, axis=(0, 2, 3), keepdims=True)
        zn = (z - mean) / jnp.sqrt(var + eps)
        return jnp.maximum(zn * g[None, :, None, None]
                           + bt[None, :, None, None], 0.0)

    h1 = cbr(x2, params["w1"], params["b1"], params["g1"], params["bt1"])
    return cbr(h1, params["w2"], params["b2"], params["g2"], params["bt2"])


# ---------------------------------------------------------------------------
if __name__ == "__main__":
    key = jax.random.PRNGKey(0)
    ks = jax.random.split(key, 10)

    N = 2
    C_up, C_skip = 8, 8            # channel counts multiple of 8 (sublane-aligned)
    Hin = Win = 8                  # x spatial; x1 spatial is 2x
    Cin = C_up + C_skip            # in_channels of Double_conv
    Cout = 8                       # out_channels

    x = jax.random.normal(ks[0], (N, C_up, Hin, Win), jnp.float32)
    x1 = jax.random.normal(ks[1], (N, C_skip, 2 * Hin, 2 * Win), jnp.float32)

    params = {
        "w1": jax.random.normal(ks[2], (Cout, Cin, 3, 3), jnp.float32)
              / np.sqrt(Cin * 9.0),
        "b1": 0.1 * jax.random.normal(ks[3], (Cout,), jnp.float32),
        "g1": 1.0 + 0.1 * jax.random.normal(ks[4], (Cout,), jnp.float32),
        "bt1": 0.1 * jax.random.normal(ks[5], (Cout,), jnp.float32),
        "w2": jax.random.normal(ks[6], (Cout, Cout, 3, 3), jnp.float32)
              / np.sqrt(Cout * 9.0),
        "b2": 0.1 * jax.random.normal(ks[7], (Cout,), jnp.float32),
        "g2": 1.0 + 0.1 * jax.random.normal(ks[8], (Cout,), jnp.float32),
        "bt2": 0.1 * jax.random.normal(ks[9], (Cout,), jnp.float32),
    }
    # (b1/b2 are consumed only by the reference; the Pallas path drops the bias,
    #  which is exactly cancelled by training-mode BatchNorm.)

    out = jax.block_until_ready(up_forward(x, x1, params))
    ref = reference_up(x, x1, params)
    err = float(jnp.max(jnp.abs(out - ref)))
    # Tolerance sized for a bf16 end-to-end MXU path (weights, upsample operator
    # and intermediates in bf16); an f32 path passes at ~1e-5.
    if not np.isfinite(err) or err > 0.15:
        raise AssertionError(f"Pallas output mismatch vs reference: {err}")

    print("KERNEL_OK")
</pallas_src>

<mosaic_0001>
module attributes {stable_mosaic.version = 11 : i64} {
  func.func @_conv1_kernel(%arg0: i32, %arg1: memref<2x8x326xbf16, #tpu.memory_space<vmem>>, %arg2: memref<2x8x64xbf16, #tpu.memory_space<vmem>>, %arg3: memref<64x326xbf16, #tpu.memory_space<vmem>>, %arg4: memref<8x144xbf16, #tpu.memory_space<vmem>>, %arg5: memref<1x576xf32, #tpu.memory_space<vmem>>, %arg6: memref<2x8x326xbf16, #tpu.memory_space<vmem>>, %arg7: memref<1x8x1xf32, #tpu.memory_space<vmem>>, %arg8: memref<1x8x1xf32, #tpu.memory_space<vmem>>) attributes {dimension_semantics = [#tpu.dimension_semantics<parallel>], iteration_bounds = array<i64: 1>, scalar_prefetch = 0 : i64, scratch_operands = 0 : i64, tpu.core_type = #tpu.core_type<tc>, window_params = [{transform_indices = @transform_0, window_bounds = array<i64: 2, 8, 326>}, {transform_indices = @transform_1, window_bounds = array<i64: 2, 8, 64>}, {pipeline_mode = #tpu.pipeline_mode<synchronous>, transform_indices = @transform_2, window_bounds = array<i64: 64, 326>}, {pipeline_mode = #tpu.pipeline_mode<synchronous>, transform_indices = @transform_3, window_bounds = array<i64: 8, 144>}, {pipeline_mode = #tpu.pipeline_mode<synchronous>, transform_indices = @transform_4, window_bounds = array<i64: 1, 576>}, {transform_indices = @transform_5, window_bounds = array<i64: 2, 8, 326>}, {transform_indices = @transform_6, window_bounds = array<i64: 1, 8, 1>}, {transform_indices = @transform_7, window_bounds = array<i64: 1, 8, 1>}]} {
    %c0 = arith.constant 0 : index
    %c0_0 = arith.constant 0 : index
    %c0_1 = arith.constant 0 : index
    %0 = vector.load %arg2[%c0, %c0_0, %c0_1] : memref<2x8x64xbf16, #tpu.memory_space<vmem>>, vector<1x8x64xbf16>
    %1 = vector.shape_cast %0 : vector<1x8x64xbf16> to vector<8x64xbf16>
    %c0_2 = arith.constant 0 : index
    %c0_3 = arith.constant 0 : index
    %2 = vector.load %arg3[%c0_2, %c0_3] : memref<64x326xbf16, #tpu.memory_space<vmem>>, vector<64x326xbf16>
    %cst = arith.constant dense<0.000000e+00> : vector<8x326xf32>
    %3 = tpu.matmul %1, %2, %cst {dimension_numbers = #tpu.dot_dimension_numbers<[1], [0], [0], [1], [0, 0, 1, 1], [], []>} : vector<8x64xbf16>, vector<64x326xbf16>, vector<8x326xf32> -> vector<8x326xf32>
    %4 = arith.truncf %3 : vector<8x326xf32> to vector<8x326xbf16>
    %c0_4 = arith.constant 0 : index
    %c0_5 = arith.constant 0 : index
    %c0_6 = arith.constant 0 : index
    %5 = vector.load %arg1[%c0_4, %c0_5, %c0_6] : memref<2x8x326xbf16, #tpu.memory_space<vmem>>, vector<1x8x326xbf16>
    %6 = vector.shape_cast %5 : vector<1x8x326xbf16> to vector<8x326xbf16>
    %7 = tpu.concatenate %6, %4 in 0 : vector<8x326xbf16>, vector<8x326xbf16> -> vector<16x326xbf16>
    %c1 = arith.constant 1 : index
    %c0_7 = arith.constant 0 : index
    %c0_8 = arith.constant 0 : index
    %8 = vector.load %arg2[%c1, %c0_7, %c0_8] : memref<2x8x64xbf16, #tpu.memory_space<vmem>>, vector<1x8x64xbf16>
    %9 = vector.shape_cast %8 : vector<1x8x64xbf16> to vector<8x64xbf16>
    %c0_9 = arith.constant 0 : index
    %c0_10 = arith.constant 0 : index
    %10 = vector.load %arg3[%c0_9, %c0_10] : memref<64x326xbf16, #tpu.memory_space<vmem>>, vector<64x326xbf16>
    %cst_11 = arith.constant dense<0.000000e+00> : vector<8x326xf32>
    %11 = tpu.matmul %9, %10, %cst_11 {dimension_numbers = #tpu.dot_dimension_numbers<[1], [0], [0], [1], [0, 0, 1, 1], [], []>} : vector<8x64xbf16>, vector<64x326xbf16>, vector<8x326xf32> -> vector<8x326xf32>
    %12 = arith.truncf %11 : vector<8x326xf32> to vector<8x326xbf16>
    %c1_12 = arith.constant 1 : index
    %c0_13 = arith.constant 0 : index
    %c0_14 = arith.constant 0 : index
    %13 = vector.load %arg1[%c1_12, %c0_13, %c0_14] : memref<2x8x326xbf16, #tpu.memory_space<vmem>>, vector<1x8x326xbf16>
    %14 = vector.shape_cast %13 : vector<1x8x326xbf16> to vector<8x326xbf16>
    %15 = tpu.concatenate %14, %12 in 0 : vector<8x326xbf16>, vector<8x326xbf16> -> vector<16x326xbf16>
    %16 = vector.extract_strided_slice %7 {offsets = [0, 0], sizes = [16, 288], strides = [1, 1]} : vector<16x326xbf16> to vector<16x288xbf16>
    %17 = vector.extract_strided_slice %15 {offsets = [0, 0], sizes = [16, 288], strides = [1, 1]} : vector<16x326xbf16> to vector<16x288xbf16>
    %18 = tpu.concatenate %16, %17 in 1 : vector<16x288xbf16>, vector<16x288xbf16> -> vector<16x576xbf16>
    %19 = vector.extract_strided_slice %7 {offsets = [0, 1], sizes = [16, 288], strides = [1, 1]} : vector<16x326xbf16> to vector<16x288xbf16>
    %20 = vector.extract_strided_slice %15 {offsets = [0, 1], sizes = [16, 288], strides = [1, 1]} : vector<16x326xbf16> to vector<16x288xbf16>
    %21 = tpu.concatenate %19, %20 in 1 : vector<16x288xbf16>, vector<16x288xbf16> -> vector<16x576xbf16>
    %22 = vector.extract_strided_slice %7 {offsets = [0, 2], sizes = [16, 288], strides = [1, 1]} : vector<16x326xbf16> to vector<16x288xbf16>
    %23 = vector.extract_strided_slice %15 {offsets = [0, 2], sizes = [16, 288], strides = [1, 1]} : vector<16x326xbf16> to vector<16x288xbf16>
    %24 = tpu.concatenate %22, %23 in 1 : vector<16x288xbf16>, vector<16x288xbf16> -> vector<16x576xbf16>
    %25 = vector.extract_strided_slice %7 {offsets = [0, 18], sizes = [16, 288], strides = [1, 1]} : vector<16x326xbf16> to vector<16x288xbf16>
    %26 = vector.extract_strided_slice %15 {offsets = [0, 18], sizes = [16, 288], strides = [1, 1]} : vector<16x326xbf16> to vector<16x288xbf16>
    %27 = tpu.concatenate %25, %26 in 1 : vector<16x288xbf16>, vector<16x288xbf16> -> vector<16x576xbf16>
    %28 = vector.extract_strided_slice %7 {offsets = [0, 19], sizes = [16, 288], strides = [1, 1]} : vector<16x326xbf16> to vector<16x288xbf16>
    %29 = vector.extract_strided_slice %15 {offsets = [0, 19], sizes = [16, 288], strides = [1, 1]} : vector<16x326xbf16> to vector<16x288xbf16>
    %30 = tpu.concatenate %28, %29 in 1 : vector<16x288xbf16>, vector<16x288xbf16> -> vector<16x576xbf16>
    %31 = vector.extract_strided_slice %7 {offsets = [0, 20], sizes = [16, 288], strides = [1, 1]} : vector<16x326xbf16> to vector<16x288xbf16>
    %32 = vector.extract_strided_slice %15 {offsets = [0, 20], sizes = [16, 288], strides = [1, 1]} : vector<16x326xbf16> to vector<16x288xbf16>
    %33 = tpu.concatenate %31, %32 in 1 : vector<16x288xbf16>, vector<16x288xbf16> -> vector<16x576xbf16>
    %34 = vector.extract_strided_slice %7 {offsets = [0, 36], sizes = [16, 288], strides = [1, 1]} : vector<16x326xbf16> to vector<16x288xbf16>
    %35 = vector.extract_strided_slice %15 {offsets = [0, 36], sizes = [16, 288], strides = [1, 1]} : vector<16x326xbf16> to vector<16x288xbf16>
    %36 = tpu.concatenate %34, %35 in 1 : vector<16x288xbf16>, vector<16x288xbf16> -> vector<16x576xbf16>
    %37 = vector.extract_strided_slice %7 {offsets = [0, 37], sizes = [16, 288], strides = [1, 1]} : vector<16x326xbf16> to vector<16x288xbf16>
    %38 = vector.extract_strided_slice %15 {offsets = [0, 37], sizes = [16, 288], strides = [1, 1]} : vector<16x326xbf16> to vector<16x288xbf16>
    %39 = tpu.concatenate %37, %38 in 1 : vector<16x288xbf16>, vector<16x288xbf16> -> vector<16x576xbf16>
    %40 = vector.extract_strided_slice %7 {offsets = [0, 38], sizes = [16, 288], strides = [1, 1]} : vector<16x326xbf16> to vector<16x288xbf16>
    %41 = vector.extract_strided_slice %15 {offsets = [0, 38], sizes = [16, 288], strides = [1, 1]} : vector<16x326xbf16> to vector<16x288xbf16>
    %42 = tpu.concatenate %40, %41 in 1 : vector<16x288xbf16>, vector<16x288xbf16> -> vector<16x576xbf16>
    %43 = tpu.concatenate %18, %21, %24, %27, %30, %33, %36, %39, %42 in 0 : vector<16x576xbf16>, vector<16x576xbf16>, vector<16x576xbf16>, vector<16x576xbf16>, vector<16x576xbf16>, vector<16x576xbf16>, vector<16x576xbf16>, vector<16x576xbf16>, vector<16x576xbf16> -> vector<144x576xbf16>
    %c0_15 = arith.constant 0 : index
    %c0_16 = arith.constant 0 : index
    %44 = vector.load %arg4[%c0_15, %c0_16] : memref<8x144xbf16, #tpu.memory_space<vmem>>, vector<8x144xbf16>
    %cst_17 = arith.constant dense<0.000000e+00> : vector<8x576xf32>
    %45 = tpu.matmul %44, %43, %cst_17 {dimension_numbers = #tpu.dot_dimension_numbers<[1], [0], [0], [1], [0, 0, 1, 1], [], []>} : vector<8x144xbf16>, vector<144x576xbf16>, vector<8x576xf32> -> vector<8x576xf32>
    %c0_18 = arith.constant 0 : index
    %c0_19 = arith.constant 0 : index
    %46 = vector.load %arg5[%c0_18, %c0_19] : memref<1x576xf32, #tpu.memory_space<vmem>>, vector<1x576xf32>
    %47 = vector.broadcast %46 : vector<1x576xf32> to vector<8x576xf32>
    %48 = arith.mulf %45, %47 : vector<8x576xf32>
    %cst_20 = arith.constant dense<0.000000e+00> : vector<8xf32>
    %49 = vector.multi_reduction <add>, %48, %cst_20 [1] : vector<8x576xf32> to vector<8xf32>
    %50 = vector.shape_cast %49 : vector<8xf32> to vector<8x1xf32>
    %c0_21 = arith.constant 0 : index
    %c0_22 = arith.constant 0 : index
    %c0_23 = arith.constant 0 : index
    %51 = vector.load %arg7[%c0_21, %c0_22, %c0_23] : memref<1x8x1xf32, #tpu.memory_space<vmem>>, vector<1x8x1xf32>
    %52 = vector.shape_cast %51 : vector<1x8x1xf32> to vector<8x1xf32>
    %53 = vector.shape_cast %50 : vector<8x1xf32> to vector<1x8x1xf32>
    tpu.vector_store %arg7[%c0_21, %c0_22, %c0_23], %53 {strides = array<i32>} : memref<1x8x1xf32, #tpu.memory_space<vmem>>, vector<1x8x1xf32>,
    %54 = arith.mulf %48, %48 : vector<8x576xf32>
    %cst_24 = arith.constant dense<0.000000e+00> : vector<8xf32>
    %55 = vector.multi_reduction <add>, %54, %cst_24 [1] : vector<8x576xf32> to vector<8xf32>
    %56 = vector.shape_cast %55 : vector<8xf32> to vector<8x1xf32>
    %c0_25 = arith.constant 0 : index
    %c0_26 = arith.constant 0 : index
    %c0_27 = arith.constant 0 : index
    %57 = vector.load %arg8[%c0_25, %c0_26, %c0_27] : memref<1x8x1xf32, #tpu.memory_space<vmem>>, vector<1x8x1xf32>
    %58 = vector.shape_cast %57 : vector<1x8x1xf32> to vector<8x1xf32>
    %59 = vector.shape_cast %56 : vector<8x1xf32> to vector<1x8x1xf32>
    tpu.vector_store %arg8[%c0_25, %c0_26, %c0_27], %59 {strides = array<i32>} : memref<1x8x1xf32, #tpu.memory_space<vmem>>, vector<1x8x1xf32>,
    %cst_28 = arith.constant 0.000000e+00 : bf16
    %60 = vector.broadcast %cst_28 : bf16 to vector<8x19xbf16>
    %cst_29 = arith.constant 0.000000e+00 : bf16
    %61 = vector.broadcast %cst_29 : bf16 to vector<8x19xbf16>
    %62 = vector.extract_strided_slice %48 {offsets = [0, 0], sizes = [8, 288], strides = [1, 1]} : vector<8x576xf32> to vector<8x288xf32>
    %63 = arith.truncf %62 : vector<8x288xf32> to vector<8x288xbf16>
    %64 = tpu.concatenate %60, %63, %61 in 1 : vector<8x19xbf16>, vector<8x288xbf16>, vector<8x19xbf16> -> vector<8x326xbf16>
    %c0_30 = arith.constant 0 : index
    %c0_31 = arith.constant 0 : index
    %c0_32 = arith.constant 0 : index
    %65 = vector.load %arg6[%c0_30, %c0_31, %c0_32] : memref<2x8x326xbf16, #tpu.memory_space<vmem>>, vector<1x8x326xbf16>
    %66 = vector.shape_cast %65 : vector<1x8x326xbf16> to vector<8x326xbf16>
    %67 = vector.shape_cast %64 : vector<8x326xbf16> to vector<1x8x326xbf16>
    tpu.vector_store %arg6[%c0_30, %c0_31, %c0_32], %67 {strides = array<i32>} : memref<2x8x326xbf16, #tpu.memory_space<vmem>>, vector<1x8x326xbf16>,
    %68 = vector.extract_strided_slice %48 {offsets = [0, 288], sizes = [8, 288], strides = [1, 1]} : vector<8x576xf32> to vector<8x288xf32>
    %69 = arith.truncf %68 : vector<8x288xf32> to vector<8x288xbf16>
    %70 = tpu.concatenate %60, %69, %61 in 1 : vector<8x19xbf16>, vector<8x288xbf16>, vector<8x19xbf16> -> vector<8x326xbf16>
    %c1_33 = arith.constant 1 : index
    %c0_34 = arith.constant 0 : index
    %c0_35 = arith.constant 0 : index
    %71 = vector.load %arg6[%c1_33, %c0_34, %c0_35] : memref<2x8x326xbf16, #tpu.memory_space<vmem>>, vector<1x8x326xbf16>
    %72 = vector.shape_cast %71 : vector<1x8x326xbf16> to vector<8x326xbf16>
    %73 = vector.shape_cast %70 : vector<8x326xbf16> to vector<1x8x326xbf16>
    tpu.vector_store %arg6[%c1_33, %c0_34, %c0_35], %73 {strides = array<i32>} : memref<2x8x326xbf16, #tpu.memory_space<vmem>>, vector<1x8x326xbf16>,
    return
  }
  func.func @transform_0(%arg0: i32) -> (i32, i32, i32) {
    %c0_i32 = arith.constant 0 : i32
    %c0_i32_0 = arith.constant 0 : i32
    %c0_i32_1 = arith.constant 0 : i32
    return %arg0, %c0_i32, %c0_i32_0 : i32, i32, i32
  }
  func.func @transform_1(%arg0: i32) -> (i32, i32, i32) {
    %c0_i32 = arith.constant 0 : i32
    %c0_i32_0 = arith.constant 0 : i32
    %c0_i32_1 = arith.constant 0 : i32
    return %arg0, %c0_i32, %c0_i32_0 : i32, i32, i32
  }
  func.func @transform_2(%arg0: i32) -> (i32, i32) {
    %c0_i32 = arith.constant 0 : i32
    %c0_i32_0 = arith.constant 0 : i32
    %c0_i32_1 = arith.constant 0 : i32
    return %c0_i32, %c0_i32_0 : i32, i32
  }
  func.func @transform_3(%arg0: i32) -> (i32, i32) {
    %c0_i32 = arith.constant 0 : i32
    %c0_i32_0 = arith.constant 0 : i32
    %c0_i32_1 = arith.constant 0 : i32
    return %c0_i32, %c0_i32_0 : i32, i32
  }
  func.func @transform_4(%arg0: i32) -> (i32, i32) {
    %c0_i32 = arith.constant 0 : i32
    %c0_i32_0 = arith.constant 0 : i32
    %c0_i32_1 = arith.constant 0 : i32
    return %c0_i32, %c0_i32_0 : i32, i32
  }
  func.func @transform_5(%arg0: i32) -> (i32, i32, i32) {
    %c0_i32 = arith.constant 0 : i32
    %c0_i32_0 = arith.constant 0 : i32
    %c0_i32_1 = arith.constant 0 : i32
    return %arg0, %c0_i32, %c0_i32_0 : i32, i32, i32
  }
  func.func @transform_6(%arg0: i32) -> (i32, i32, i32) {
    %c0_i32 = arith.constant 0 : i32
    %c0_i32_0 = arith.constant 0 : i32
    %c0_i32_1 = arith.constant 0 : i32
    return %arg0, %c0_i32, %c0_i32_0 : i32, i32, i32
  }
  func.func @transform_7(%arg0: i32) -> (i32, i32, i32) {
    %c0_i32 = arith.constant 0 : i32
    %c0_i32_0 = arith.constant 0 : i32
    %c0_i32_1 = arith.constant 0 : i32
    return %arg0, %c0_i32, %c0_i32_0 : i32, i32, i32
  }
}

module attributes {stable_mosaic.version = 11 : i64} {
  func.func @_conv2_kernel(%arg0: i32, %arg1: memref<2x8x326xbf16, #tpu.memory_space<vmem>>, %arg2: memref<8x1xf32, #tpu.memory_space<vmem>>, %arg3: memref<8x1xf32, #tpu.memory_space<vmem>>, %arg4: memref<1x326xf32, #tpu.memory_space<vmem>>, %arg5: memref<8x72xbf16, #tpu.memory_space<vmem>>, %arg6: memref<1x576xf32, #tpu.memory_space<vmem>>, %arg7: memref<2x8x288xbf16, #tpu.memory_space<vmem>>, %arg8: memref<1x8x1xf32, #tpu.memory_space<vmem>>, %arg9: memref<1x8x1xf32, #tpu.memory_space<vmem>>) attributes {dimension_semantics = [#tpu.dimension_semantics<parallel>], iteration_bounds = array<i64: 1>, scalar_prefetch = 0 : i64, scratch_operands = 0 : i64, tpu.core_type = #tpu.core_type<tc>, window_params = [{transform_indices = @transform_0, window_bounds = array<i64: 2, 8, 326>}, {pipeline_mode = #tpu.pipeline_mode<synchronous>, transform_indices = @transform_1, window_bounds = array<i64: 8, 1>}, {pipeline_mode = #tpu.pipeline_mode<synchronous>, transform_indices = @transform_2, window_bounds = array<i64: 8, 1>}, {pipeline_mode = #tpu.pipeline_mode<synchronous>, transform_indices = @transform_3, window_bounds = array<i64: 1, 326>}, {pipeline_mode = #tpu.pipeline_mode<synchronous>, transform_indices = @transform_4, window_bounds = array<i64: 8, 72>}, {pipeline_mode = #tpu.pipeline_mode<synchronous>, transform_indices = @transform_5, window_bounds = array<i64: 1, 576>}, {transform_indices = @transform_6, window_bounds = array<i64: 2, 8, 288>}, {transform_indices = @transform_7, window_bounds = array<i64: 1, 8, 1>}, {transform_indices = @transform_8, window_bounds = array<i64: 1, 8, 1>}]} {
    %c0 = arith.constant 0 : index
    %c0_0 = arith.constant 0 : index
    %c0_1 = arith.constant 0 : index
    %0 = vector.load %arg1[%c0, %c0_0, %c0_1] : memref<2x8x326xbf16, #tpu.memory_space<vmem>>, vector<1x8x326xbf16>
    %1 = vector.shape_cast %0 : vector<1x8x326xbf16> to vector<8x326xbf16>
    %2 = arith.extf %1 : vector<8x326xbf16> to vector<8x326xf32>
    %c0_2 = arith.constant 0 : index
    %c0_3 = arith.constant 0 : index
    %3 = vector.load %arg2[%c0_2, %c0_3] : memref<8x1xf32, #tpu.memory_space<vmem>>, vector<8x1xf32>
    %4 = vector.broadcast %3 : vector<8x1xf32> to vector<8x326xf32>
    %5 = arith.mulf %2, %4 : vector<8x326xf32>
    %c0_4 = arith.constant 0 : index
    %c0_5 = arith.constant 0 : index
    %6 = vector.load %arg3[%c0_4, %c0_5] : memref<8x1xf32, #tpu.memory_space<vmem>>, vector<8x1xf32>
    %7 = vector.broadcast %6 : vector<8x1xf32> to vector<8x326xf32>
    %8 = arith.addf %5, %7 : vector<8x326xf32>
    %cst = arith.constant 0.000000e+00 : f32
    %9 = vector.broadcast %cst : f32 to vector<8x326xf32>
    %10 = arith.maximumf %8, %9 : vector<8x326xf32>
    %c0_6 = arith.constant 0 : index
    %c0_7 = arith.constant 0 : index
    %11 = vector.load %arg4[%c0_6, %c0_7] : memref<1x326xf32, #tpu.memory_space<vmem>>, vector<1x326xf32>
    %12 = vector.broadcast %11 : vector<1x326xf32> to vector<8x326xf32>
    %13 = arith.mulf %10, %12 : vector<8x326xf32>
    %14 = arith.truncf %13 : vector<8x326xf32> to vector<8x326xbf16>
    %c1 = arith.constant 1 : index
    %c0_8 = arith.constant 0 : index
    %c0_9 = arith.constant 0 : index
    %15 = vector.load %arg1[%c1, %c0_8, %c0_9] : memref<2x8x326xbf16, #tpu.memory_space<vmem>>, vector<1x8x326xbf16>
    %16 = vector.shape_cast %15 : vector<1x8x326xbf16> to vector<8x326xbf16>
    %17 = arith.extf %16 : vector<8x326xbf16> to vector<8x326xf32>
    %c0_10 = arith.constant 0 : index
    %c0_11 = arith.constant 0 : index
    %18 = vector.load %arg2[%c0_10, %c0_11] : memref<8x1xf32, #tpu.memory_space<vmem>>, vector<8x1xf32>
    %19 = vector.broadcast %18 : vector<8x1xf32> to vector<8x326xf32>
    %20 = arith.mulf %17, %19 : vector<8x326xf32>
    %c0_12 = arith.constant 0 : index
    %c0_13 = arith.constant 0 : index
    %21 = vector.load %arg3[%c0_12, %c0_13] : memref<8x1xf32, #tpu.memory_space<vmem>>, vector<8x1xf32>
    %22 = vector.broadcast %21 : vector<8x1xf32> to vector<8x326xf32>
    %23 = arith.addf %20, %22 : vector<8x326xf32>
    %cst_14 = arith.constant 0.000000e+00 : f32
    %24 = vector.broadcast %cst_14 : f32 to vector<8x326xf32>
    %25 = arith.maximumf %23, %24 : vector<8x326xf32>
    %c0_15 = arith.constant 0 : index
    %c0_16 = arith.constant 0 : index
    %26 = vector.load %arg4[%c0_15, %c0_16] : memref<1x326xf32, #tpu.memory_space<vmem>>, vector<1x326xf32>
    %27 = vector.broadcast %26 : vector<1x326xf32> to vector<8x326xf32>
    %28 = arith.mulf %25, %27 : vector<8x326xf32>
    %29 = arith.truncf %28 : vector<8x326xf32> to vector<8x326xbf16>
    %30 = vector.extract_strided_slice %14 {offsets = [0, 0], sizes = [8, 288], strides = [1, 1]} : vector<8x326xbf16> to vector<8x288xbf16>
    %31 = vector.extract_strided_slice %29 {offsets = [0, 0], sizes = [8, 288], strides = [1, 1]} : vector<8x326xbf16> to vector<8x288xbf16>
    %32 = tpu.concatenate %30, %31 in 1 : vector<8x288xbf16>, vector<8x288xbf16> -> vector<8x576xbf16>
    %33 = vector.extract_strided_slice %14 {offsets = [0, 1], sizes = [8, 288], strides = [1, 1]} : vector<8x326xbf16> to vector<8x288xbf16>
    %34 = vector.extract_strided_slice %29 {offsets = [0, 1], sizes = [8, 288], strides = [1, 1]} : vector<8x326xbf16> to vector<8x288xbf16>
    %35 = tpu.concatenate %33, %34 in 1 : vector<8x288xbf16>, vector<8x288xbf16> -> vector<8x576xbf16>
    %36 = vector.extract_strided_slice %14 {offsets = [0, 2], sizes = [8, 288], strides = [1, 1]} : vector<8x326xbf16> to vector<8x288xbf16>
    %37 = vector.extract_strided_slice %29 {offsets = [0, 2], sizes = [8, 288], strides = [1, 1]} : vector<8x326xbf16> to vector<8x288xbf16>
    %38 = tpu.concatenate %36, %37 in 1 : vector<8x288xbf16>, vector<8x288xbf16> -> vector<8x576xbf16>
    %39 = vector.extract_strided_slice %14 {offsets = [0, 18], sizes = [8, 288], strides = [1, 1]} : vector<8x326xbf16> to vector<8x288xbf16>
    %40 = vector.extract_strided_slice %29 {offsets = [0, 18], sizes = [8, 288], strides = [1, 1]} : vector<8x326xbf16> to vector<8x288xbf16>
    %41 = tpu.concatenate %39, %40 in 1 : vector<8x288xbf16>, vector<8x288xbf16> -> vector<8x576xbf16>
    %42 = vector.extract_strided_slice %14 {offsets = [0, 19], sizes = [8, 288], strides = [1, 1]} : vector<8x326xbf16> to vector<8x288xbf16>
    %43 = vector.extract_strided_slice %29 {offsets = [0, 19], sizes = [8, 288], strides = [1, 1]} : vector<8x326xbf16> to vector<8x288xbf16>
    %44 = tpu.concatenate %42, %43 in 1 : vector<8x288xbf16>, vector<8x288xbf16> -> vector<8x576xbf16>
    %45 = vector.extract_strided_slice %14 {offsets = [0, 20], sizes = [8, 288], strides = [1, 1]} : vector<8x326xbf16> to vector<8x288xbf16>
    %46 = vector.extract_strided_slice %29 {offsets = [0, 20], sizes = [8, 288], strides = [1, 1]} : vector<8x326xbf16> to vector<8x288xbf16>
    %47 = tpu.concatenate %45, %46 in 1 : vector<8x288xbf16>, vector<8x288xbf16> -> vector<8x576xbf16>
    %48 = vector.extract_strided_slice %14 {offsets = [0, 36], sizes = [8, 288], strides = [1, 1]} : vector<8x326xbf16> to vector<8x288xbf16>
    %49 = vector.extract_strided_slice %29 {offsets = [0, 36], sizes = [8, 288], strides = [1, 1]} : vector<8x326xbf16> to vector<8x288xbf16>
    %50 = tpu.concatenate %48, %49 in 1 : vector<8x288xbf16>, vector<8x288xbf16> -> vector<8x576xbf16>
    %51 = vector.extract_strided_slice %14 {offsets = [0, 37], sizes = [8, 288], strides = [1, 1]} : vector<8x326xbf16> to vector<8x288xbf16>
    %52 = vector.extract_strided_slice %29 {offsets = [0, 37], sizes = [8, 288], strides = [1, 1]} : vector<8x326xbf16> to vector<8x288xbf16>
    %53 = tpu.concatenate %51, %52 in 1 : vector<8x288xbf16>, vector<8x288xbf16> -> vector<8x576xbf16>
    %54 = vector.extract_strided_slice %14 {offsets = [0, 38], sizes = [8, 288], strides = [1, 1]} : vector<8x326xbf16> to vector<8x288xbf16>
    %55 = vector.extract_strided_slice %29 {offsets = [0, 38], sizes = [8, 288], strides = [1, 1]} : vector<8x326xbf16> to vector<8x288xbf16>
    %56 = tpu.concatenate %54, %55 in 1 : vector<8x288xbf16>, vector<8x288xbf16> -> vector<8x576xbf16>
    %57 = tpu.concatenate %32, %35, %38, %41, %44, %47, %50, %53, %56 in 0 : vector<8x576xbf16>, vector<8x576xbf16>, vector<8x576xbf16>, vector<8x576xbf16>, vector<8x576xbf16>, vector<8x576xbf16>, vector<8x576xbf16>, vector<8x576xbf16>, vector<8x576xbf16> -> vector<72x576xbf16>
    %c0_17 = arith.constant 0 : index
    %c0_18 = arith.constant 0 : index
    %58 = vector.load %arg5[%c0_17, %c0_18] : memref<8x72xbf16, #tpu.memory_space<vmem>>, vector<8x72xbf16>
    %cst_19 = arith.constant dense<0.000000e+00> : vector<8x576xf32>
    %59 = tpu.matmul %58, %57, %cst_19 {dimension_numbers = #tpu.dot_dimension_numbers<[1], [0], [0], [1], [0, 0, 1, 1], [], []>} : vector<8x72xbf16>, vector<72x576xbf16>, vector<8x576xf32> -> vector<8x576xf32>
    %c0_20 = arith.constant 0 : index
    %c0_21 = arith.constant 0 : index
    %60 = vector.load %arg6[%c0_20, %c0_21] : memref<1x576xf32, #tpu.memory_space<vmem>>, vector<1x576xf32>
    %61 = vector.broadcast %60 : vector<1x576xf32> to vector<8x576xf32>
    %62 = arith.mulf %59, %61 : vector<8x576xf32>
    %cst_22 = arith.constant dense<0.000000e+00> : vector<8xf32>
    %63 = vector.multi_reduction <add>, %62, %cst_22 [1] : vector<8x576xf32> to vector<8xf32>
    %64 = vector.shape_cast %63 : vector<8xf32> to vector<8x1xf32>
    %c0_23 = arith.constant 0 : index
    %c0_24 = arith.constant 0 : index
    %c0_25 = arith.constant 0 : index
    %65 = vector.load %arg8[%c0_23, %c0_24, %c0_25] : memref<1x8x1xf32, #tpu.memory_space<vmem>>, vector<1x8x1xf32>
    %66 = vector.shape_cast %65 : vector<1x8x1xf32> to vector<8x1xf32>
    %67 = vector.shape_cast %64 : vector<8x1xf32> to vector<1x8x1xf32>
    tpu.vector_store %arg8[%c0_23, %c0_24, %c0_25], %67 {strides = array<i32>} : memref<1x8x1xf32, #tpu.memory_space<vmem>>, vector<1x8x1xf32>,
    %68 = arith.mulf %62, %62 : vector<8x576xf32>
    %cst_26 = arith.constant dense<0.000000e+00> : vector<8xf32>
    %69 = vector.multi_reduction <add>, %68, %cst_26 [1] : vector<8x576xf32> to vector<8xf32>
    %70 = vector.shape_cast %69 : vector<8xf32> to vector<8x1xf32>
    %c0_27 = arith.constant 0 : index
    %c0_28 = arith.constant 0 : index
    %c0_29 = arith.constant 0 : index
    %71 = vector.load %arg9[%c0_27, %c0_28, %c0_29] : memref<1x8x1xf32, #tpu.memory_space<vmem>>, vector<1x8x1xf32>
    %72 = vector.shape_cast %71 : vector<1x8x1xf32> to vector<8x1xf32>
    %73 = vector.shape_cast %70 : vector<8x1xf32> to vector<1x8x1xf32>
    tpu.vector_store %arg9[%c0_27, %c0_28, %c0_29], %73 {strides = array<i32>} : memref<1x8x1xf32, #tpu.memory_space<vmem>>, vector<1x8x1xf32>,
    %74 = vector.extract_strided_slice %62 {offsets = [0, 0], sizes = [8, 288], strides = [1, 1]} : vector<8x576xf32> to vector<8x288xf32>
    %75 = arith.truncf %74 : vector<8x288xf32> to vector<8x288xbf16>
    %c0_30 = arith.constant 0 : index
    %c0_31 = arith.constant 0 : index
    %c0_32 = arith.constant 0 : index
    %76 = vector.load %arg7[%c0_30, %c0_31, %c0_32] : memref<2x8x288xbf16, #tpu.memory_space<vmem>>, vector<1x8x288xbf16>
    %77 = vector.shape_cast %76 : vector<1x8x288xbf16> to vector<8x288xbf16>
    %78 = vector.shape_cast %75 : vector<8x288xbf16> to vector<1x8x288xbf16>
    tpu.vector_store %arg7[%c0_30, %c0_31, %c0_32], %78 {strides = array<i32>} : memref<2x8x288xbf16, #tpu.memory_space<vmem>>, vector<1x8x288xbf16>,
    %79 = vector.extract_strided_slice %62 {offsets = [0, 288], sizes = [8, 288], strides = [1, 1]} : vector<8x576xf32> to vector<8x288xf32>
    %80 = arith.truncf %79 : vector<8x288xf32> to vector<8x288xbf16>
    %c1_33 = arith.constant 1 : index
    %c0_34 = arith.constant 0 : index
    %c0_35 = arith.constant 0 : index
    %81 = vector.load %arg7[%c1_33, %c0_34, %c0_35] : memref<2x8x288xbf16, #tpu.memory_space<vmem>>, vector<1x8x288xbf16>
    %82 = vector.shape_cast %81 : vector<1x8x288xbf16> to vector<8x288xbf16>
    %83 = vector.shape_cast %80 : vector<8x288xbf16> to vector<1x8x288xbf16>
    tpu.vector_store %arg7[%c1_33, %c0_34, %c0_35], %83 {strides = array<i32>} : memref<2x8x288xbf16, #tpu.memory_space<vmem>>, vector<1x8x288xbf16>,
    return
  }
  func.func @transform_0(%arg0: i32) -> (i32, i32, i32) {
    %c0_i32 = arith.constant 0 : i32
    %c0_i32_0 = arith.constant 0 : i32
    %c0_i32_1 = arith.constant 0 : i32
    return %arg0, %c0_i32, %c0_i32_0 : i32, i32, i32
  }
  func.func @transform_1(%arg0: i32) -> (i32, i32) {
    %c0_i32 = arith.constant 0 : i32
    %c0_i32_0 = arith.constant 0 : i32
    %c0_i32_1 = arith.constant 0 : i32
    return %c0_i32, %c0_i32_0 : i32, i32
  }
  func.func @transform_2(%arg0: i32) -> (i32, i32) {
    %c0_i32 = arith.constant 0 : i32
    %c0_i32_0 = arith.constant 0 : i32
    %c0_i32_1 = arith.constant 0 : i32
    return %c0_i32, %c0_i32_0 : i32, i32
  }
  func.func @transform_3(%arg0: i32) -> (i32, i32) {
    %c0_i32 = arith.constant 0 : i32
    %c0_i32_0 = arith.constant 0 : i32
    %c0_i32_1 = arith.constant 0 : i32
    return %c0_i32, %c0_i32_0 : i32, i32
  }
  func.func @transform_4(%arg0: i32) -> (i32, i32) {
    %c0_i32 = arith.constant 0 : i32
    %c0_i32_0 = arith.constant 0 : i32
    %c0_i32_1 = arith.constant 0 : i32
    return %c0_i32, %c0_i32_0 : i32, i32
  }
  func.func @transform_5(%arg0: i32) -> (i32, i32) {
    %c0_i32 = arith.constant 0 : i32
    %c0_i32_0 = arith.constant 0 : i32
    %c0_i32_1 = arith.constant 0 : i32
    return %c0_i32, %c0_i32_0 : i32, i32
  }
  func.func @transform_6(%arg0: i32) -> (i32, i32, i32) {
    %c0_i32 = arith.constant 0 : i32
    %c0_i32_0 = arith.constant 0 : i32
    %c0_i32_1 = arith.constant 0 : i32
    return %arg0, %c0_i32, %c0_i32_0 : i32, i32, i32
  }
  func.func @transform_7(%arg0: i32) -> (i32, i32, i32) {
    %c0_i32 = arith.constant 0 : i32
    %c0_i32_0 = arith.constant 0 : i32
    %c0_i32_1 = arith.constant 0 : i32
    return %arg0, %c0_i32, %c0_i32_0 : i32, i32, i32
  }
  func.func @transform_8(%arg0: i32) -> (i32, i32, i32) {
    %c0_i32 = arith.constant 0 : i32
    %c0_i32_0 = arith.constant 0 : i32
    %c0_i32_1 = arith.constant 0 : i32
    return %arg0, %c0_i32, %c0_i32_0 : i32, i32, i32
  }
}

</mosaic_0001>

<bundles_post_ra>
// kernel: up_forward.3
= control target key start
LH: loop header
LB: loop body
LE: loop exit
PB: predicated region body
PF: predicated region fallthrough
CT: control target
= control target key end

     0   :  { %v691_v0 = vmov 0   ;;  %v55_v3 = vlaneseq  ;;  %s693_s13 = smov 91   ;;  %s694_s14 = smov 92   ;;  %vm269_vm0 = vcmask 736256   ;;  %vm308_vm1 = vcmask 1043456   ;;  %s946_s1 = inlined_call_operand.vmem [shape: f32[8,1], index: 1, kind: input, shape index: {}]   ;;  %s947_s2 = inlined_call_operand.vmem [shape: f32[8,1], index: 2, kind: input, shape index: {}]   ;;  %s948_s0 = inlined_call_operand.vmem [shape: bf16[2,8,326], index: 0, kind: input, shape index: {}]   ;;  %s949_s3 = inlined_call_operand.vmem [shape: f32[1,326], index: 3, kind: input, shape index: {}]   ;;  %s950_s4 = inlined_call_operand.vmem [shape: bf16[8,72], index: 4, kind: input, shape index: {}]   ;;  %s951_s5 = inlined_call_operand.vmem [shape: f32[1,576], index: 5, kind: input, shape index: {}]   ;;  %s952_s6 = inlined_call_operand.vmem [shape: bf16[2,8,288], index: 6, kind: output, shape index: {0}]   ;;  %s953_s7 = inlined_call_operand.vmem [shape: f32[1,8,1], index: 7, kind: output, shape index: {1}]   ;;  %s954_s8 = inlined_call_operand.vmem [shape: f32[1,8,1], index: 8, kind: output, shape index: {2}]  }
   0x1   :  { %690 = vset.pattern.permute.xlu0 %v691_v0  ;;  %v32_v1 = vld [vmem:[%s946_s1] sm:$0xff]  ;;  %436 = vmatprep.mubr.bf16.mxu0 %v691_v0  ;;  %v28_v5 = vld [vmem:[%s948_s0 + $0x8] ss:$12 sps:$4 sm:$0xff]   ;;  %s695_s15 = smov 108   ;;  %s696_s16 = smov 109   ;;  %v632_v34 = vld [vmem:[%s948_s0 + $0xc] sm:$0xff] }
   0x2   :  { %35 = vperm.xlu0 %690, %v32_v1   ;;  %477 = vmatprep.mubr.bf16.mxu1 %v691_v0  ;;  %v41_v2 = vld [vmem:[%s947_s2] sm:$0xff]  ;;  %v769_v6 = vshrl.u32 %v55_v3, 7  ;;  %v31_v9 = vunpack.c.l.bf16 %v28_v5  ;;  %v79_v35 = vunpack.c.l.bf16 %v632_v34  ;;  %v81_v36 = vunpack.c.h.bf16 %v28_v5  ;;  %s697_s19 = smov 110   ;;  %s698_s20 = smov 126  }
   0x3   :  { %v27_v4 = vld [vmem:[%s948_s0] sm:$0xff]  ;;  %v80_v39 = vunpack.c.h.bf16 %v632_v34  ;;  %s699_s0 = smov 127   ;;  %s700_s21 = smov 122   ;;  %vm248_vm2 = vcmask 744448   ;;  %vm227_vm3 = vcmask 752640   ;;  %vm206_vm4 = vcmask 883712  }
   0x4   :  { %v29_v7 = vunpack.c.l.bf16 %v27_v4  ;;  %v30_v8 = vunpack.c.h.bf16 %v27_v4  ;;  %v57_v11 = vsub.s32 0, %v769_v6  ;;  %v53_v12 = vld [vmem:[%s949_s3] sm:$0x7]  ;;  %v65_v13 = vsub.s32 2, %v769_v6  ;;  %s692_s3 = smov 90   ;;  %s701_s22 = smov 123  }
   0x5   :  { %v61_v17 = vsub.s32 1, %v769_v6  ;;  %s702_s23 = smov 124   ;;  %s703_s24 = smov 12   ;;  %vm185_vm5 = vcmask 891904   ;;  %vm164_vm6 = vcmask 900096   ;;  %vm143_vm7 = vcmask 1031168  }
   0x6   :  { %44 = vperm.xlu0 %690, %v41_v2   ;;  %v58_v18 = vrot.slane %v53_v12, %v57_v11  ;;  %v66_v20 = vrot.slane %v53_v12, %v65_v13  ;;  %s704_s25 = smov 13   ;;  %s705_s26 = smov 14   ;;  %vm122_vm8 = vcmask 1039360   ;;  %vm278_vm9 = vcmask 998400  }
   0x7   :  { %v62_v24 = vrot.slane %v53_v12, %v61_v17  ;;  %s706_s27 = smov 30   ;;  %s707_s28 = smov 31   ;;  %vm106_vm10 = vcmask 261120   ;;  %vm386_vm11 = vcmask 588800   ;;  %vm257_vm12 = vcmask 1006592  }
   0x8   :  { %s708_s29 = smov 32   ;;  %vm710_vm13 = vmmov 0   ;;  %vm236_vm14 = vcmask 1014784   ;;  %vm215_vm15 = vcmask 97280   ;;  %s711_s2 = smov 96  }
  0x7d   :  { %v36_v10 = vpop.permute.xlu0 %35 }
  0x7e   :  { %v38_v14 = vmul.f32 %v36_v10, %v29_v7  ;;  %v39_v15 = vmul.f32 %v36_v10, %v30_v8  ;;  %v40_v16 = vmul.f32 %v36_v10, %v31_v9  ;;  %v82_v37 = vmul.f32 %v79_v35, %v36_v10 }
  0x7f   :  { %v84_v40 = vmul.f32 %v81_v36, %v36_v10  ;;  %v83_v43 = vmul.f32 %v80_v39, %v36_v10 }
  0x81   :  { %v45_v19 = vpop.permute.xlu0 %44 }
  0x82   :  { %v47_v21 = vadd.f32 %v45_v19, %v38_v14  ;;  %v48_v22 = vadd.f32 %v45_v19, %v39_v15  ;;  %v49_v23 = vadd.f32 %v45_v19, %v40_v16  ;;  %v85_v38 = vadd.f32 %v82_v37, %v45_v19 }
  0x83   :  { %v87_v41 = vadd.f32 %v84_v40, %v45_v19  ;;  %v86_v44 = vadd.f32 %v83_v43, %v45_v19 }
  0x84   :  { %v50_v25 = vmax.f32 %v47_v21, 0.0  ;;  %v51_v26 = vmax.f32 %v48_v22, 0.0  ;;  %v52_v27 = vmax.f32 %v49_v23, 0.0  ;;  %v88_v42 = vmax.f32 %v85_v38, 0.0 }
  0x85   :  { %v90_v45 = vmax.f32 %v87_v41, 0.0  ;;  %v89_v47 = vmax.f32 %v86_v44, 0.0 }
  0x86   :  { %v70_v28 = vmul.f32 %v58_v18, %v50_v25  ;;  %v72_v29 = vmul.f32 %v66_v20, %v52_v27  ;;  %v71_v30 = vmul.f32 %v62_v24, %v51_v26  ;;  %v91_v46 = vmul.f32 %v88_v42, %v58_v18 }
  0x87   :  { %v93_v48 = vmul.f32 %v90_v45, %v66_v20  ;;  %v92_v50 = vmul.f32 %v89_v47, %v62_v24 }
  0x88   :  { %v783_v31 = vpack.c.bf16 %v70_v28, %v70_v28  ;;  %v785_v32 = vpack.c.bf16 %v72_v29, %v72_v29  ;;  %v789_v33 = vpack.c.bf16 %v71_v30, %v71_v30  ;;  %v94_v49 = vpack.c.bf16 %v91_v46, %v91_v46 }
  0x89   :  { %v96_v51 = vpack.c.bf16 %v93_v48, %v93_v48  ;;  %v95_v52 = vpack.c.bf16 %v92_v50, %v92_v50 }
  0x8a   :  { %267 = vrot.lane.b32.xlu0 %v785_v32, %s692_s3  ;;  %263 = vrot.lane.b32.xlu1 %v783_v31, %s692_s3 }
  0x8e   :  { %246 = vrot.lane.b32.xlu0 %v785_v32, %s693_s13  ;;  %265 = vrot.lane.b32.xlu1 %v789_v33, %s692_s3 }
  0x92   :  { %223 = vrot.lane.b32.xlu0 %v789_v33, %s694_s14  ;;  %244 = vrot.lane.b32.xlu1 %v789_v33, %s693_s13 }
  0x96   :  { %221 = vrot.lane.b32.xlu0 %v783_v31, %s694_s14  ;;  %242 = vrot.lane.b32.xlu1 %v783_v31, %s693_s13 }
  0x9a   :  { %204 = vrot.lane.b32.xlu0 %v785_v32, %s695_s15  ;;  %225 = vrot.lane.b32.xlu1 %v785_v32, %s694_s14 }
  0x9e   :  { %181 = vrot.lane.b32.xlu0 %v789_v33, %s696_s16  ;;  %202 = vrot.lane.b32.xlu1 %v789_v33, %s695_s15 }
  0xa2   :  { %179 = vrot.lane.b32.xlu0 %v783_v31, %s696_s16  ;;  %200 = vrot.lane.b32.xlu1 %v783_v31, %s695_s15 }
  0xa6   :  { %162 = vrot.lane.b32.xlu0 %v785_v32, %s697_s19  ;;  %183 = vrot.lane.b32.xlu1 %v785_v32, %s696_s16 }
  0xaa   :  { %139 = vrot.lane.b32.xlu0 %v789_v33, %s698_s20  ;;  %160 = vrot.lane.b32.xlu1 %v789_v33, %s697_s19 }
  0xae   :  { %137 = vrot.lane.b32.xlu0 %v783_v31, %s698_s20  ;;  %158 = vrot.lane.b32.xlu1 %v783_v31, %s697_s19 }
  0xb2   :  { %120 = vrot.lane.b32.xlu0 %v785_v32, %s699_s0  ;;  %141 = vrot.lane.b32.xlu1 %v785_v32, %s698_s20 }
  0xb6   :  { %272 = vrot.lane.b32.xlu0 %v94_v49, %s700_s21  ;;  %118 = vrot.lane.b32.xlu1 %v789_v33, %s699_s0 }
  0xba   :  { %276 = vrot.lane.b32.xlu0 %v96_v51, %s700_s21  ;;  %116 = vrot.lane.b32.xlu1 %v783_v31, %s699_s0 }
  0xbe   :  { %253 = vrot.lane.b32.xlu0 %v95_v52, %s701_s22  ;;  %274 = vrot.lane.b32.xlu1 %v95_v52, %s700_s21 }
  0xc2   :  { %230 = vrot.lane.b32.xlu0 %v94_v49, %s702_s23  ;;  %251 = vrot.lane.b32.xlu1 %v94_v49, %s701_s22 }
  0xc6   :  { %234 = vrot.lane.b32.xlu0 %v96_v51, %s702_s23  ;;  %255 = vrot.lane.b32.xlu1 %v96_v51, %s701_s22 }
  0xca   :  { %211 = vrot.lane.b32.xlu0 %v95_v52, %s703_s24  ;;  %232 = vrot.lane.b32.xlu1 %v95_v52, %s702_s23 }
  0xce   :  { %190 = vrot.lane.b32.xlu0 %v95_v52, %s704_s25  ;;  %209 = vrot.lane.b32.xlu1 %v94_v49, %s703_s24 }
  0xd2   :  { %169 = vrot.lane.b32.xlu0 %v95_v52, %s705_s26  ;;  %188 = vrot.lane.b32.xlu1 %v94_v49, %s704_s25 }
  0xd6   :  { %146 = vrot.lane.b32.xlu0 %v94_v49, %s706_s27  ;;  %167 = vrot.lane.b32.xlu1 %v94_v49, %s705_s26 }
  0xda   :  { %192 = vrot.lane.b32.xlu0 %v96_v51, %s704_s25  ;;  %213 = vrot.lane.b32.xlu1 %v96_v51, %s703_s24 }
  0xde   :  { %127 = vrot.lane.b32.xlu0 %v95_v52, %s707_s28  ;;  %148 = vrot.lane.b32.xlu1 %v95_v52, %s706_s27 }
  0xe2   :  { %100 = vrot.lane.b32.xlu0 %v94_v49, %s708_s29  ;;  %125 = vrot.lane.b32.xlu1 %v94_v49, %s707_s28 }
  0xe6   :  { %150 = vrot.lane.b32.xlu0 %v96_v51, %s706_s27  ;;  %171 = vrot.lane.b32.xlu1 %v96_v51, %s705_s26 }
  0xea   :  { %104 = vrot.lane.b32.xlu0 %v96_v51, %s708_s29  ;;  %102 = vrot.lane.b32.xlu1 %v95_v52, %s708_s29 }
  0xee   :  { %129 = vrot.lane.b32.xlu1 %v96_v51, %s707_s28 }
  0xfc   :  { %v816_v53 = vpop.permute.xlu0 %267  ;;  %v264_v54 = vpop.permute.xlu1 %263 }
 0x100   :  { %v818_v55 = vpop.permute.xlu0 %246  ;;  %v266_v56 = vpop.permute.xlu1 %265 }
 0x101   :  { %v271_v57 = vsel %vm269_vm0, %v266_v56, %v816_v53  ;;  %v270_v58 = vsel %vm269_vm0, %v264_v54, %v266_v56  ;;  %vm194_vm0 = vcmask 105472  }
 0x102   :  { %634 = vmatprep.subr.msk.bf16.mxu0 %vm308_vm1, %v271_v57  ;;  %v391_v59 = vsel %vm308_vm1, %v270_v58, 0 }
 0x103   :  { %411 = vmatpush1.bf16.msra.mxu0 %v391_v59 }
 0x104   :  { %v224_v60 = vpop.permute.xlu0 %223  ;;  %v245_v61 = vpop.permute.xlu1 %244 }
 0x105   :  { %v250_v0 = vsel %vm248_vm2, %v245_v61, %v818_v55 }
 0x106   :  { %v304_v3 = vrot.slane %v250_v0, 4 }
 0x108   :  { %v222_v62 = vpop.permute.xlu0 %221  ;;  %v243_v63 = vpop.permute.xlu1 %242 }
 0x109   :  { %v249_v1 = vsel %vm248_vm2, %v243_v63, %v245_v61  ;;  %v228_v8 = vsel %vm227_vm3, %v222_v62, %v224_v60  ;;  %v855_v61 = vld [vmem:[%s950_s4] sm:$0xf]  ;;  %v709_v62 = vmov 0.0   ;;  %vm173_vm2 = vcmask 113664  }
 0x10a   :  { %v303_v2 = vrot.slane %v249_v1, 4 }
 0x10c   :  { %v824_v4 = vpop.permute.xlu0 %204  ;;  %v826_v5 = vpop.permute.xlu1 %225  ;;  %v368_v10 = vsel %vm308_vm1, %v228_v8, %v303_v2 }
 0x10d   :  { %v229_v7 = vsel %vm227_vm3, %v224_v60, %v826_v5  ;;  %vm152_vm3 = vcmask 244736  }
 0x10e   :  { %v372_v9 = vsel %vm308_vm1, %v229_v7, %v304_v3 }
 0x10f   :  { %412 = vmatprep.subr.bf16.mxu0 %v372_v9 }
 0x110   :  { %v182_v12 = vpop.permute.xlu0 %181  ;;  %413 = vmatpush1.bf16.msra.mxu0 %v368_v10  ;;  %v203_v14 = vpop.permute.xlu1 %202 }
 0x111   :  { %v208_v18 = vsel %vm206_vm4, %v203_v14, %v824_v4 }
 0x112   :  { %v298_v21 = vrot.slane %v208_v18, 4 }
 0x114   :  { %v180_v15 = vpop.permute.xlu0 %179  ;;  %v201_v16 = vpop.permute.xlu1 %200 }
 0x115   :  { %v207_v19 = vsel %vm206_vm4, %v201_v16, %v203_v14  ;;  %v186_v25 = vsel %vm185_vm5, %v180_v15, %v182_v12  ;;  %vm131_vm4 = vcmask 252928  }
 0x116   :  { %v297_v20 = vrot.slane %v207_v19, 4 }
 0x118   :  { %v832_v22 = vpop.permute.xlu0 %162  ;;  %v834_v23 = vpop.permute.xlu1 %183  ;;  %v349_v27 = vsel %vm308_vm1, %v186_v25, %v297_v20 }
 0x119   :  { %v187_v24 = vsel %vm185_vm5, %v182_v12, %v834_v23  ;;  %vm595_vm5 = vcmask 257024  }
 0x11a   :  { %v353_v26 = vsel %vm308_vm1, %v187_v24, %v298_v21 }
 0x11b   :  { %414 = vmatprep.subr.bf16.mxu0 %v353_v26 }
 0x11c   :  { %v140_v28 = vpop.permute.xlu0 %139  ;;  %415 = vmatpush1.bf16.msra.mxu0 %v349_v27  ;;  %v161_v29 = vpop.permute.xlu1 %160 }
 0x11d   :  { %v166_v35 = vsel %vm164_vm6, %v161_v29, %v832_v22 }
 0x11e   :  { %v292_v38 = vrot.slane %v166_v35, 4 }
 0x120   :  { %v138_v30 = vpop.permute.xlu0 %137  ;;  %v159_v34 = vpop.permute.xlu1 %158 }
 0x121   :  { %v165_v36 = vsel %vm164_vm6, %v159_v34, %v161_v29  ;;  %v144_v42 = vsel %vm143_vm7, %v138_v30, %v140_v28  ;;  %vm561_vm6 = vcmask 523264  }
 0x122   :  { %v291_v37 = vrot.slane %v165_v36, 4 }
 0x124   :  { %v840_v39 = vpop.permute.xlu0 %120  ;;  %v842_v40 = vpop.permute.xlu1 %141  ;;  %v330_v44 = vsel %vm308_vm1, %v144_v42, %v291_v37 }
 0x125   :  { %v145_v41 = vsel %vm143_vm7, %v140_v28, %v842_v40  ;;  %vm566_vm7 = vcmask 7168  }
 0x126   :  { %v334_v43 = vsel %vm308_vm1, %v145_v41, %v292_v38 }
 0x127   :  { %416 = vmatprep.subr.bf16.mxu0 %v334_v43 }
 0x128   :  { %v273_v45 = vpop.permute.xlu0 %272  ;;  %417 = vmatpush1.bf16.msra.mxu0 %v330_v44  ;;  %v119_v46 = vpop.permute.xlu1 %118 }
 0x129   :  { %v124_v47 = vsel %vm122_vm8, %v119_v46, %v840_v39 }
 0x12a   :  { %v286_v48 = vrot.slane %v124_v47, 4 }
 0x12c   :  { %v277_v49 = vpop.permute.xlu0 %276  ;;  %v117_v50 = vpop.permute.xlu1 %116  ;;  %v315_v51 = vsel %vm308_vm1, %v789_v33, %v286_v48 }
 0x12d   :  { %v123_v52 = vsel %vm122_vm8, %v117_v50, %v119_v46  ;;  %418 = vmatprep.subr.bf16.mxu0 %v315_v51  ;;  %vm613_vm8 = vcmask 785408  }
 0x12e   :  { %v285_v54 = vrot.slane %v123_v52, 4 }
 0x130   :  { %v254_v56 = vpop.permute.xlu0 %253  ;;  %v275_v57 = vpop.permute.xlu1 %274  ;;  %v311_v58 = vsel %vm308_vm1, %v783_v31, %v285_v54  ;;  %v402_v31 = vsel %vm308_vm1, %v277_v49, 0 }
 0x131   :  { %v279_v59 = vsel %vm278_vm9, %v273_v45, %v275_v57  ;;  %419 = vmatpush1.bf16.msra.mxu0 %v311_v58  ;;  %v280_v60 = vsel %vm278_vm9, %v275_v57, %v277_v49 }
 0x132   :  { %636 = vmatprep.subr.msk.bf16.mxu1 %vm308_vm1, %v280_v60  ;;  %v283_v33 = vsel %vm106_vm10, %v816_v53, %v279_v59  ;;  %655 = vmatprep.subr.bf16.mxu0 %v709_v62 }
 0x133   :  { %v396_v63 = vsel %vm308_vm1, %v283_v33, 0 }
 0x134   :  { %v231_v0 = vpop.permute.xlu0 %230  ;;  %452 = vmatpush1.bf16.msra.mxu1 %v396_v63  ;;  %v252_v1 = vpop.permute.xlu1 %251  ;;  %635 = vmatmul.mubr.msk.bf16.vlgmr.msra.gmra.mxu0 %vm386_vm11, %v855_v61 }
 0x135   :  { %656 = vmatpush3.bf16.msra.mxu0 %v402_v31  ;;  %665 = vmatprep.mubr.msk.bf16.mxu0 %vm710_vm13, %v709_v62  ;;  %v258_v53 = vsel %vm257_vm12, %v252_v1, %v254_v56 }
 0x136   :  { %657 = vmatprep.subr.bf16.mxu0 %v709_v62  ;;  %v262_v9 = vsel %vm106_vm10, %v818_v55, %v258_v53 }
 0x137   :  { %v305_v16 = vrot.slane %v262_v9, 4 }
 0x138   :  { %v235_v2 = vpop.permute.xlu0 %234  ;;  %v256_v3 = vpop.permute.xlu1 %255 }
 0x139   :  { %v259_v7 = vsel %vm257_vm12, %v254_v56, %v256_v3  ;;  %v307_v8 = vrot.slane %v256_v3, 4 }
 0x13a   :  { %v306_v12 = vrot.slane %v259_v7, 4 }
 0x13b   :  { %v383_v10 = vsel %vm308_vm1, %v235_v2, %v307_v8 }
 0x13c   :  { %v212_v14 = vpop.permute.xlu0 %211  ;;  %658 = vmatpush3.bf16.msra.mxu0 %v383_v10  ;;  %v233_v15 = vpop.permute.xlu1 %232 }
 0x13d   :  { %v237_v18 = vsel %vm236_vm14, %v231_v0, %v233_v15  ;;  %v238_v19 = vsel %vm236_vm14, %v233_v15, %v235_v2  ;;  %659 = vmatprep.subr.bf16.mxu0 %v709_v62 }
 0x13e   :  { %v379_v20 = vsel %vm308_vm1, %v238_v19, %v306_v12  ;;  %v241_v21 = vsel %vm106_vm10, %v826_v5, %v237_v18 }
 0x13f   :  { %453 = vmatprep.subr.bf16.mxu1 %v379_v20  ;;  %v375_v55 = vsel %vm308_vm1, %v241_v21, %v305_v16 }
 0x140   :  { %v191_v24 = vpop.permute.xlu0 %190  ;;  %454 = vmatpush1.bf16.msra.mxu1 %v375_v55  ;;  %v210_v25 = vpop.permute.xlu1 %209 }
 0x141   :  { %v216_v26 = vsel %vm215_vm15, %v210_v25, %v212_v14  ;;  %v220_v27 = vsel %vm106_vm10, %v824_v4, %v210_v25 }
 0x142   :  { %v299_v28 = vrot.slane %v220_v27, 4  ;;  %v300_v29 = vrot.slane %v216_v26, 4 }
 0x144   :  { %v170_v30 = vpop.permute.xlu0 %169  ;;  %v189_v34 = vpop.permute.xlu1 %188 }
 0x145   :  { %v195_v35 = vsel %vm194_vm0, %v189_v34, %v191_v24  ;;  %v199_v5 = vsel %vm106_vm10, %v834_v23, %v189_v34 }
 0x146   :  { %v360_v36 = vsel %vm308_vm1, %v195_v35, %v300_v29  ;;  %v356_v37 = vsel %vm308_vm1, %v199_v5, %v299_v28 }
 0x147   :  { %455 = vmatprep.subr.bf16.mxu1 %v360_v36 }
 0x148   :  { %v147_v38 = vpop.permute.xlu0 %146  ;;  %456 = vmatpush1.bf16.msra.mxu1 %v356_v37  ;;  %v168_v41 = vpop.permute.xlu1 %167 }
 0x149   :  { %v178_v4 = vsel %vm106_vm10, %v832_v22, %v168_v41  ;;  %v174_v44 = vsel %vm173_vm2, %v168_v41, %v170_v30  ;;  %v157_v22 = vsel %vm106_vm10, %v842_v40, %v147_v38 }
 0x14a   :  { %v293_v23 = vrot.slane %v178_v4, 4  ;;  %v294_v48 = vrot.slane %v174_v44, 4 }
 0x14c   :  { %v193_v42 = vpop.permute.xlu0 %192  ;;  %v214_v43 = vpop.permute.xlu1 %213  ;;  %v337_v56 = vsel %vm308_vm1, %v157_v22, %v293_v23 }
 0x14d   :  { %v217_v45 = vsel %vm215_vm15, %v212_v14, %v214_v43  ;;  %v196_v47 = vsel %vm194_vm0, %v191_v24, %v193_v42 }
 0x14e   :  { %v301_v46 = vrot.slane %v217_v45, 4 }
 0x150   :  { %v128_v49 = vpop.permute.xlu0 %127  ;;  %v149_v50 = vpop.permute.xlu1 %148  ;;  %v364_v51 = vsel %vm308_vm1, %v196_v47, %v301_v46 }
 0x151   :  { %v153_v52 = vsel %vm152_vm3, %v147_v38, %v149_v50  ;;  %660 = vmatpush3.bf16.msra.mxu0 %v364_v51 }
 0x152   :  { %v341_v54 = vsel %vm308_vm1, %v153_v52, %v294_v48  ;;  %661 = vmatprep.subr.bf16.mxu0 %v709_v62 }
 0x153   :  { %457 = vmatprep.subr.bf16.mxu1 %v341_v54 }
 0x154   :  { %v101_v57 = vpop.permute.xlu0 %100  ;;  %458 = vmatpush1.bf16.msra.mxu1 %v337_v56  ;;  %v126_v58 = vpop.permute.xlu1 %125 }
 0x155   :  { %v136_v59 = vsel %vm106_vm10, %v840_v39, %v126_v58  ;;  %v132_v63 = vsel %vm131_vm4, %v126_v58, %v128_v49  ;;  %v112_v39 = vsel %vm106_vm10, %v785_v32, %v101_v57 }
 0x156   :  { %v287_v0 = vrot.slane %v136_v59, 4  ;;  %v288_v53 = vrot.slane %v132_v63, 4 }
 0x158   :  { %v151_v60 = vpop.permute.xlu0 %150  ;;  %v172_v33 = vpop.permute.xlu1 %171  ;;  %v318_v9 = vsel %vm308_vm1, %v112_v39, %v287_v0 }
 0x159   :  { %v175_v40 = vsel %vm173_vm2, %v170_v30, %v172_v33  ;;  %v154_v1 = vsel %vm152_vm3, %v149_v50, %v151_v60 }
 0x15a   :  { %v295_v31 = vrot.slane %v175_v40, 4 }
 0x15c   :  { %v103_v2 = vpop.permute.xlu1 %102  ;;  %v345_v3 = vsel %vm308_vm1, %v154_v1, %v295_v31  ;;  %v105_v10 = vpop.permute.xlu0 %104 }
 0x15d   :  { %v107_v7 = vsel %vm106_vm10, %v101_v57, %v103_v2  ;;  %662 = vmatpush3.bf16.msra.mxu0 %v345_v3  ;;  %v108_v16 = vsel %vm106_vm10, %v103_v2, %v105_v10 }
 0x15e   :  { %v322_v8 = vsel %vm308_vm1, %v107_v7, %v288_v53  ;;  %663 = vmatprep.subr.bf16.mxu0 %v709_v62  ;;  %v526_v62 = vld [vmem:[%s951_s5] sm:$0x1f] }
 0x15f   :  { %459 = vmatprep.subr.bf16.mxu1 %v322_v8  ;;  %v531_v18 = vrot.slane %v526_v62, %v57_v11  ;;  %v535_v19 = vrot.slane %v526_v62, %v61_v17  ;;  %v539_v28 = vrot.slane %v526_v62, %v65_v13  ;;  %v546_v17 = vsub.s32 4, %v769_v6 }
 0x160   :  { %460 = vmatpush1.bf16.msra.mxu1 %v318_v9  ;;  %v130_v12 = vpop.permute.xlu1 %129 }
 0x161   :  { %v133_v14 = vsel %vm131_vm4, %v128_v49, %v130_v12  ;;  %v547_v38 = vrot.slane %v526_v62, %v546_v17 }
 0x162   :  { %v289_v15 = vrot.slane %v133_v14, 4 }
 0x163   :  { %637 = vmatmul.mubr.msk.bf16.vlgmr.msra.gmra.mxu1 %vm386_vm11, %v855_v61 }
 0x164   :  { %v326_v32 = vsel %vm308_vm1, %v108_v16, %v289_v15 }
 0x165   :  { %664 = vmatpush3.bf16.msra.mxu0 %v326_v32 }
 0x168   :  { %666 = vmatmul.mubr.msk.bf16.vlgmr.msra.gmra.mxu0 %vm386_vm11, %v855_v61  ;;  %v542_v61 = vsub.s32 3, %v769_v6 }
 0x16a   :  { %v543_v30 = vrot.slane %v526_v62, %v542_v61 }
 0x1f4   :  { %v438_v20 = vpop.f32.mrf.mxu0 }
 0x1f5   :  { %v553_v21 = vmul.f32 %v531_v18, %v438_v20 }
 0x1f6   :  { %v440_v55 = vpop.f32.mrf.mxu0 }
 0x1f7   :  { %v554_v24 = vmul.f32 %v535_v19, %v440_v55  ;;  %v568_v11 = vmul.f32 %v553_v21, %v553_v21 }
 0x1f8   :  { %v442_v25 = vpop.f32.mrf.mxu0 }
 0x1f9   :  { %v645_v26 = vpack.c.bf16 %v554_v24, %v553_v21  ;;  %v569_v29 = vmul.f32 %v554_v24, %v554_v24  ;;  %v558_v35 = vadd.f32 %v554_v24, %v553_v21 }
 0x1fa   :  { %v443_v27 = vpop.f32.mrf.mxu0 }
 0x1fb   :  { %594 = vst [vmem:[%s952_s6] sm:$0xff] %v645_v26  ;;  %v573_v36 = vadd.f32 %v569_v29, %v568_v11 }
 0x223   :  { %v479_v34 = vpop.f32.mrf.mxu1 }
 0x224   :  { %v555_v5 = vmul.f32 %v539_v28, %v479_v34 }
 0x225   :  { %v481_v37 = vpop.f32.mrf.mxu1 }
 0x226   :  { %v646_v41 = vpack.c.bf16 %v555_v5, %v555_v5  ;;  %v556_v4 = vmul.f32 %v543_v30, %v481_v37  ;;  %v559_v42 = vadd.f32 %v558_v35, %v555_v5  ;;  %v570_v43 = vmul.f32 %v555_v5, %v555_v5 }
 0x227   :  { %v483_v44 = vpop.f32.mrf.mxu1 }
 0x228   :  { %v571_v45 = vmul.f32 %v556_v4, %v556_v4  ;;  %v520_v46 = vpop.f32.mrf.mxu0  ;;  %v574_v13 = vadd.f32 %v573_v36, %v570_v43  ;;  %596 = vst.msk [vmem:[%s952_s6 + $0x8] sm:$0xf] %vm595_vm5, %v646_v41  ;;  %v560_v48 = vadd.f32 %v559_v42, %v556_v4  ;;  %v647_v59 = vpack.c.bf16 %v556_v4, %v555_v5 }
 0x229   :  { %v557_v6 = vmul.f32 %v547_v38, %v520_v46  ;;  %v484_v23 = vpop.f32.mrf.mxu1 }
 0x22a   :  { %v667_v47 = vpop.f32.mrf.mxu0  ;;  %v575_v22 = vadd.f32 %v574_v13, %v571_v45 }
 0x22b   :  { %v562_v49 = vsel %vm561_vm6, %v557_v6, 0.0  ;;  %v572_v50 = vmul.f32 %v557_v6, %v557_v6  ;;  %v648_v58 = vpack.c.bf16 %v557_v6, %v557_v6 }
 0x22c   :  { %v523_v51 = vpop.f32.mrf.mxu0  ;;  %v563_v52 = vadd.f32 %v562_v49, %v560_v48 }
 0x22d   :  { %v576_v54 = vsel %vm561_vm6, %v572_v50, 0.0 }
 0x22e   :  { %564 = vadd.xlane.f32.xlu1 %v563_v52  ;;  %v668_v56 = vpop.f32.mrf.mxu0  ;;  %v577_v57 = vadd.f32 %v576_v54, %v575_v22 }
 0x230   :  { %578 = vadd.xlane.f32.xlu0 %v577_v57 }
 0x23f   :  { %607 = vrot.lane.b32.xlu1 %v648_v58, %s711_s2 }
 0x246   :  { %605 = vrot.lane.b32.xlu0 %v647_v59, %s711_s2 }
 0x2b7   :  { %v565_v60 = vpop.xlane.xlu1 %564 }
 0x2b8   :  { %567 = vst.msk [vmem:[%s953_s7] sm:$0xff] %vm566_vm7, %v565_v60 }
 0x2b9   :  { %v579_v33 = vpop.xlane.xlu0 %578 }
 0x2ba   :  { %580 = vst.msk [vmem:[%s954_s8] sm:$0xff] %vm566_vm7, %v579_v33 }
 0x2bb   :  { %v608_v63 = vpop.permute.xlu1 %607 }
 0x2bc   :  { %644 = vst.msk [vmem:[%s952_s6 + $0x14] sm:$0xf] %vm595_vm5, %v608_v63  ;;  %v610_v31 = vrot.slane %v608_v63, 4 }
 0x2bd   :  { %v606_v40 = vpop.permute.xlu0 %605 }
 0x2be   :  { %v609_v0 = vrot.slane %v606_v40, 4 }
 0x2c0   :  { %v612_v1 = vsel %vm308_vm1, %v609_v0, %v610_v31 }
 0x2c1   :  { %v614_v53 = vsel %vm613_vm8, %v606_v40, %v612_v1 }
 0x2c2   :  { %643 = vst [vmem:[%s952_s6 + $0xc] sm:$0xff] %v614_v53 }

// kernel: up_forward.2
= control target key start
LH: loop header
LB: loop body
LE: loop exit
PB: predicated region body
PF: predicated region fallthrough
CT: control target
= control target key end

     0   :  { %v943_v1 = vmov 0   ;;  %vm105_vm0 = vcmask 523264   ;;  %v944_v12 = vmov 0.0   ;;  %vm945_vm1 = vmmov 0   ;;  %s947_s30 = smov 91   ;;  %s948_s8 = smov 110   ;;  %s1278_s2 = inlined_call_operand.vmem [shape: bf16[64,326], index: 2, kind: input, shape index: {}]   ;;  %s1279_s0 = inlined_call_operand.vmem [shape: bf16[2,8,326], index: 0, kind: input, shape index: {}]   ;;  %s1280_s1 = inlined_call_operand.vmem [shape: bf16[2,8,64], index: 1, kind: input, shape index: {}]   ;;  %s1281_s3 = inlined_call_operand.vmem [shape: bf16[8,144], index: 3, kind: input, shape index: {}]   ;;  %s1282_s4 = inlined_call_operand.vmem [shape: f32[1,576], index: 4, kind: input, shape index: {}]   ;;  %s1283_s5 = inlined_call_operand.vmem [shape: bf16[2,8,326], index: 5, kind: output, shape index: {0}]   ;;  %s1284_s7 = inlined_call_operand.vmem [shape: f32[1,8,1], index: 7, kind: output, shape index: {2}]   ;;  %s1285_s6 = inlined_call_operand.vmem [shape: f32[1,8,1], index: 6, kind: output, shape index: {1}]  }
   0x1   :  { %v919_v0 = vld [vmem:[%s1278_s2 + $0x4c] ss:$12 sps:$4 sm:$0xff]   ;;  %141 = vmatprep.mubr.bf16.mxu1 %v943_v1  ;;  %258 = vmatprep.mubr.bf16.mxu0 %v943_v1  ;;  %v921_v2 = vld [vmem:[%s1278_s2 + $0x48] ss:$12 sps:$4 sm:$0xff]   ;;  %v924_v4 = vld [vmem:[%s1278_s2 + $0x30] ss:$12 sps:$4 sm:$0xff]  }
   0x2   :  { %117 = vmatprep.subr.bf16.mxu1 %v919_v0  ;;  %v922_v3 = vld [vmem:[%s1278_s2 + $0x34] ss:$12 sps:$4 sm:$0xff]   ;;  %234 = vmatprep.subr.bf16.mxu0 %v919_v0  ;;  %v925_v5 = vld [vmem:[%s1278_s2 + $0x1c] ss:$12 sps:$4 sm:$0xff]   ;;  %v927_v6 = vld [vmem:[%s1278_s2 + $0x18] ss:$12 sps:$4 sm:$0xff]  }
   0x3   :  { %118 = vmatpush1.bf16.msra.mxu1 %v921_v2  ;;  %235 = vmatpush1.bf16.msra.mxu0 %v921_v2  ;;  %v928_v7 = vld [vmem:[%s1278_s2 + $0x4] ss:$12 sps:$4 sm:$0xff]   ;;  %v930_v8 = vld [vmem:[%s1278_s2] ss:$12 sps:$4 sm:$0xff]   ;;  %v934_v15 = vld [vmem:[%s1278_s2 + $0x8] ss:$12 sps:$4 sm:$0xff]  }
   0x4   :  { %119 = vmatprep.subr.bf16.mxu1 %v922_v3  ;;  %236 = vmatprep.subr.bf16.mxu0 %v922_v3  ;;  %v24_v9 = vld [vmem:[%s1280_s1] sm:$0xf]  ;;  %v931_v10 = vld [vmem:[%s1278_s2 + $0x50] ss:$12 sps:$4 sm:$0xff]   ;;  %v844_v11 = vld [vmem:[%s1280_s1 + $0x4] sm:$0xf] }
   0x5   :  { %v932_v13 = vld [vmem:[%s1278_s2 + $0x38] ss:$12 sps:$4 sm:$0xff]   ;;  %v933_v14 = vld [vmem:[%s1278_s2 + $0x20] ss:$12 sps:$4 sm:$0xff]   ;;  %vm209_vm2 = vcmask 1043456   ;;  %s946_s2 = smov 108  }
   0x6   :  { %v193_v16 = vld [vmem:[%s1279_s0] sm:$0xff]  ;;  %s949_s9 = smov 92   ;;  %v847_v31 = vld [vmem:[%s1279_s0 + $0xc] sm:$0xff]  ;;  %s950_s12 = smov 127   ;;  %v939_v46 = vld [vmem:[%s1279_s0 + $0x8] ss:$0 sps:$4 sm:$0xff]  }
   0x7   :  { %120 = vmatpush1.bf16.msra.mxu1 %v924_v4  ;;  %237 = vmatpush1.bf16.msra.mxu0 %v924_v4  ;;  %v841_v20 = vcombine.low %v193_v16, %v193_v16  ;;  %v842_v32 = vcombine.high %v193_v16, %v193_v16  ;;  %s951_s13 = smov 109   ;;  %v849_v34 = vcombine.low %v847_v31, %v847_v31  ;;  %s952_s14 = smov 126   ;;  %v1129_v55 = vld [vmem:[%s1281_s3] sm:$0xff]  ;;  %vm572_vm3 = vcmask 130048   ;;  %v940_v57 = vld [vmem:[%s1279_s0 + $0x14] ss:$0 sps:$4 sm:$0xff]  }
   0x8   :  { %121 = vmatprep.subr.bf16.mxu1 %v925_v5  ;;  %238 = vmatprep.subr.bf16.mxu0 %v925_v5  ;;  %s953_s15 = smov 123   ;;  %v850_v44 = vcombine.high %v847_v31, %v847_v31  ;;  %s954_s18 = smov 90   ;;  %v1133_v56 = vcombine.high %v1129_v55, %v1129_v55  ;;  %vm519_vm4 = vcmask 744448   ;;  %vm493_vm5 = vcmask 752640  }
   0x9   :  { %s955_s19 = smov 124   ;;  %s956_s20 = smov 12   ;;  %vm467_vm6 = vcmask 883712   ;;  %vm441_vm7 = vcmask 891904   ;;  %vm415_vm8 = vcmask 900096   ;;  %vm389_vm9 = vcmask 1031168  }
   0xa   :  { %s957_s23 = smov 13   ;;  %s958_s3 = smov 14   ;;  %vm363_vm10 = vcmask 1039360   ;;  %vm530_vm11 = vcmask 1006592   ;;  %vm345_vm12 = vcmask 261120   ;;  %vm545_vm13 = vcmask 736256  }
   0xb   :  { %122 = vmatpush1.bf16.msra.mxu1 %v927_v6  ;;  %239 = vmatpush1.bf16.msra.mxu0 %v927_v6  ;;  %s959_s0 = smov 30   ;;  %s960_s26 = smov 31   ;;  %vm504_vm14 = vcmask 1014784   ;;  %vm478_vm15 = vcmask 97280  }
   0xc   :  { %123 = vmatprep.subr.bf16.mxu1 %v928_v7  ;;  %240 = vmatprep.subr.bf16.mxu0 %v928_v7  ;;  %s961_s1 = smov 32   ;;  %s962_s27 = smov 122  }
   0xf   :  { %124 = vmatpush1.bf16.msra.mxu1 %v930_v8  ;;  %241 = vmatpush1.bf16.msra.mxu0 %v930_v8 }
  0x10   :  { %873 = vmatprep.subr.bf16.mxu1 %v944_v12 }
  0x12   :  { %839 = vmatmul.mubr.msk.bf16.vlgmr.msra.gmra.mxu1 %vm105_vm0, %v24_v9  ;;  %845 = vmatmul.mubr.msk.bf16.vlgmr.msra.gmra.mxu0 %vm105_vm0, %v844_v11 }
  0x13   :  { %874 = vmatpush3.bf16.msra.mxu1 %v931_v10  ;;  %881 = vmatprep.mubr.msk.bf16.mxu1 %vm945_vm1, %v944_v12 }
  0x14   :  { %875 = vmatprep.subr.bf16.mxu1 %v944_v12  ;;  %854 = vmatprep.mubr.msk.bf16.mxu0 %vm572_vm3, %v1133_v56 }
  0x17   :  { %876 = vmatpush3.bf16.msra.mxu1 %v932_v13 }
  0x18   :  { %877 = vmatprep.subr.bf16.mxu1 %v944_v12 }
  0x1b   :  { %878 = vmatpush3.bf16.msra.mxu1 %v933_v14 }
  0x1c   :  { %879 = vmatprep.subr.bf16.mxu1 %v944_v12 }
  0x1f   :  { %880 = vmatpush3.bf16.msra.mxu1 %v934_v15 }
  0x20   :  { %885 = vmatprep.subr.bf16.mxu1 %v944_v12 }
  0x22   :  { %882 = vmatmul.mubr.msk.bf16.vlgmr.msra.gmra.mxu1 %vm105_vm0, %v24_v9 }
  0x23   :  { %886 = vmatpush3.bf16.msra.mxu1 %v931_v10  ;;  %893 = vmatprep.mubr.msk.bf16.mxu1 %vm945_vm1, %v944_v12  ;;  %vm452_vm1 = vcmask 105472  }
  0x24   :  { %887 = vmatprep.subr.bf16.mxu1 %v944_v12 }
  0x27   :  { %888 = vmatpush3.bf16.msra.mxu1 %v932_v13 }
  0x28   :  { %889 = vmatprep.subr.bf16.mxu1 %v944_v12 }
  0x2b   :  { %890 = vmatpush3.bf16.msra.mxu1 %v933_v14 }
  0x2c   :  { %891 = vmatprep.subr.bf16.mxu1 %v944_v12 }
  0x2f   :  { %892 = vmatpush3.bf16.msra.mxu1 %v934_v15 }
  0x32   :  { %894 = vmatmul.mubr.msk.bf16.vlgmr.msra.gmra.mxu1 %vm105_vm0, %v844_v11 }
  0x33   :  { %855 = vmatprep.mubr.msk.bf16.mxu1 %vm572_vm3, %v1133_v56 }
  0xd2   :  { %v143_v17 = vpop.f32.mrf.mxu1  ;;  %v260_v18 = vpop.f32.mrf.mxu0 }
  0xd3   :  { %v190_v19 = vpack.c.bf16 %v143_v17, %v143_v17  ;;  %v307_v30 = vpack.c.bf16 %v260_v18, %v260_v18 }
  0xd4   :  { %v145_v21 = vpop.f32.mrf.mxu1  ;;  %v262_v22 = vpop.f32.mrf.mxu0 }
  0xd5   :  { %v206_v23 = vrot.slane %v190_v19, 4  ;;  %v191_v29 = vpack.c.bf16 %v145_v21, %v145_v21  ;;  %v324_v35 = vrot.slane %v307_v30, 4  ;;  %v308_v42 = vpack.c.bf16 %v262_v22, %v262_v22 }
  0xd6   :  { %v147_v24 = vpop.f32.mrf.mxu1  ;;  %v264_v25 = vpop.f32.mrf.mxu0 }
  0xd7   :  { %v1057_v26 = vsel %vm209_vm2, %v841_v20, %v206_v23  ;;  %v207_v33 = vrot.slane %v191_v29, 4  ;;  %v1082_v39 = vsel %vm209_vm2, %v849_v34, %v324_v35  ;;  %v325_v45 = vrot.slane %v308_v42, 4 }
  0xd8   :  { %v148_v27 = vpop.f32.mrf.mxu1  ;;  %461 = vrot.lane.b32.xlu0 %v1057_v26, %s946_s2  ;;  %513 = vrot.lane.b32.xlu1 %v1057_v26, %s947_s30  ;;  %v265_v28 = vpop.f32.mrf.mxu0 }
  0xd9   :  { %v1075_v37 = vsel %vm209_vm2, %v842_v32, %v207_v33  ;;  %v332_v49 = vsel %vm209_vm2, %v850_v44, %v325_v45 }
  0xdc   :  { %409 = vrot.lane.b32.xlu0 %v1057_v26, %s948_s8  ;;  %487 = vrot.lane.b32.xlu1 %v1057_v26, %s949_s9 }
  0xe0   :  { %357 = vrot.lane.b32.xlu0 %v1057_v26, %s950_s12  ;;  %435 = vrot.lane.b32.xlu1 %v1057_v26, %s951_s13 }
  0xe2   :  { %v184_v36 = vpop.f32.mrf.mxu1 }
  0xe3   :  { %v192_v43 = vpack.c.bf16 %v184_v36, %v184_v36 }
  0xe4   :  { %515 = vrot.lane.b32.xlu0 %v1075_v37, %s947_s30  ;;  %383 = vrot.lane.b32.xlu1 %v1057_v26, %s952_s14  ;;  %v883_v38 = vpop.f32.mrf.mxu1 }
  0xe5   :  { %v208_v47 = vrot.slane %v192_v43, 4 }
  0xe6   :  { %v187_v40 = vpop.f32.mrf.mxu1 }
  0xe7   :  { %v1104_v51 = vsel %vm209_vm2, %v939_v46, %v208_v47 }
  0xe8   :  { %463 = vrot.lane.b32.xlu0 %v1075_v37, %s946_s2  ;;  %524 = vrot.lane.b32.xlu1 %v1082_v39, %s953_s15  ;;  %v884_v41 = vpop.f32.mrf.mxu1 }
  0xec   :  { %411 = vrot.lane.b32.xlu0 %v1075_v37, %s948_s8  ;;  %489 = vrot.lane.b32.xlu1 %v1075_v37, %s949_s9 }
  0xf0   :  { %359 = vrot.lane.b32.xlu0 %v1075_v37, %s950_s12  ;;  %437 = vrot.lane.b32.xlu1 %v1075_v37, %s951_s13 }
  0xf2   :  { %v301_v48 = vpop.f32.mrf.mxu1 }
  0xf3   :  { %v309_v54 = vpack.c.bf16 %v301_v48, %v301_v48 }
  0xf4   :  { %526 = vrot.lane.b32.xlu0 %v332_v49, %s953_s15  ;;  %385 = vrot.lane.b32.xlu1 %v1075_v37, %s952_s14  ;;  %v895_v50 = vpop.f32.mrf.mxu1 }
  0xf5   :  { %v326_v58 = vrot.slane %v309_v54, 4 }
  0xf6   :  { %v304_v52 = vpop.f32.mrf.mxu1 }
  0xf7   :  { %v335_v59 = vsel %vm209_vm2, %v940_v57, %v326_v58  ;;  %v1192_v52 = vcombine.low %v1129_v55, %v1129_v55  ;;  %vm426_vm2 = vcmask 113664  }
  0xf8   :  { %517 = vrot.lane.b32.xlu0 %v1104_v51, %s947_s30  ;;  %541 = vrot.lane.b32.xlu1 %v1075_v37, %s954_s18  ;;  %v896_v53 = vpop.f32.mrf.mxu1 }
  0xfc   :  { %491 = vrot.lane.b32.xlu0 %v1104_v51, %s949_s9  ;;  %465 = vrot.lane.b32.xlu1 %v1104_v51, %s946_s2  ;;  %s963_s2 = smov 19  }
 0x100   :  { %539 = vrot.lane.b32.xlu0 %v1057_v26, %s954_s18  ;;  %498 = vrot.lane.b32.xlu1 %v1082_v39, %s955_s19 }
 0x104   :  { %439 = vrot.lane.b32.xlu0 %v1104_v51, %s951_s13  ;;  %413 = vrot.lane.b32.xlu1 %v1104_v51, %s948_s8 }
 0x108   :  { %500 = vrot.lane.b32.xlu0 %v332_v49, %s955_s19  ;;  %474 = vrot.lane.b32.xlu1 %v332_v49, %s956_s20 }
 0x10c   :  { %387 = vrot.lane.b32.xlu0 %v1104_v51, %s952_s14  ;;  %361 = vrot.lane.b32.xlu1 %v1104_v51, %s950_s12 }
 0x110   :  { %472 = vrot.lane.b32.xlu0 %v1082_v39, %s956_s20  ;;  %448 = vrot.lane.b32.xlu1 %v332_v49, %s957_s23 }
 0x114   :  { %446 = vrot.lane.b32.xlu0 %v1082_v39, %s957_s23  ;;  %420 = vrot.lane.b32.xlu1 %v1082_v39, %s958_s3 }
 0x118   :  { %543 = vrot.lane.b32.xlu0 %v1104_v51, %s954_s18  ;;  %528 = vrot.lane.b32.xlu1 %v335_v59, %s953_s15 }
 0x11c   :  { %422 = vrot.lane.b32.xlu0 %v332_v49, %s958_s3  ;;  %502 = vrot.lane.b32.xlu1 %v335_v59, %s955_s19 }
 0x120   :  { %394 = vrot.lane.b32.xlu0 %v1082_v39, %s959_s0  ;;  %396 = vrot.lane.b32.xlu1 %v332_v49, %s959_s0 }
 0x124   :  { %370 = vrot.lane.b32.xlu0 %v332_v49, %s960_s26  ;;  %368 = vrot.lane.b32.xlu1 %v1082_v39, %s960_s26 }
 0x128   :  { %476 = vrot.lane.b32.xlu0 %v335_v59, %s956_s20  ;;  %450 = vrot.lane.b32.xlu1 %v335_v59, %s957_s23 }
 0x12c   :  { %339 = vrot.lane.b32.xlu0 %v1082_v39, %s961_s1  ;;  %341 = vrot.lane.b32.xlu1 %v332_v49, %s961_s1 }
 0x130   :  { %424 = vrot.lane.b32.xlu0 %v335_v59, %s958_s3  ;;  %398 = vrot.lane.b32.xlu1 %v335_v59, %s959_s0 }
 0x134   :  { %550 = vrot.lane.b32.xlu0 %v1082_v39, %s962_s27  ;;  %343 = vrot.lane.b32.xlu1 %v335_v59, %s961_s1 }
 0x138   :  { %372 = vrot.lane.b32.xlu0 %v335_v59, %s960_s26  ;;  %552 = vrot.lane.b32.xlu1 %v332_v49, %s962_s27 }
 0x13c   :  { %554 = vrot.lane.b32.xlu0 %v335_v59, %s962_s27 }
 0x14a   :  { %v462_v60 = vpop.permute.xlu0 %461  ;;  %v514_v61 = vpop.permute.xlu1 %513 }
 0x14e   :  { %v410_v62 = vpop.permute.xlu0 %409  ;;  %v488_v63 = vpop.permute.xlu1 %487 }
 0x152   :  { %v358_v0 = vpop.permute.xlu0 %357  ;;  %v436_v2 = vpop.permute.xlu1 %435 }
 0x156   :  { %v516_v3 = vpop.permute.xlu0 %515  ;;  %v384_v4 = vpop.permute.xlu1 %383 }
 0x157   :  { %v520_v16 = vsel %vm519_vm4, %v514_v61, %v516_v3 }
 0x15a   :  { %v464_v5 = vpop.permute.xlu0 %463  ;;  %v1155_v6 = vpop.permute.xlu1 %524 }
 0x15b   :  { %v468_v24 = vsel %vm467_vm6, %v462_v60, %v464_v5 }
 0x15e   :  { %v412_v7 = vpop.permute.xlu0 %411  ;;  %v490_v8 = vpop.permute.xlu1 %489 }
 0x15f   :  { %v494_v20 = vsel %vm493_vm5, %v488_v63, %v490_v8  ;;  %v416_v33 = vsel %vm415_vm8, %v410_v62, %v412_v7 }
 0x162   :  { %v360_v9 = vpop.permute.xlu0 %359  ;;  %v438_v10 = vpop.permute.xlu1 %437 }
 0x163   :  { %v442_v29 = vsel %vm441_vm7, %v436_v2, %v438_v10  ;;  %v364_v42 = vsel %vm363_vm10, %v358_v0, %v360_v9 }
 0x166   :  { %v1157_v11 = vpop.permute.xlu0 %526  ;;  %v386_v12 = vpop.permute.xlu1 %385 }
 0x167   :  { %v390_v38 = vsel %vm389_vm9, %v384_v4, %v386_v12  ;;  %v531_v47 = vsel %vm530_vm11, %v1155_v6, %v1157_v11 }
 0x16a   :  { %v518_v13 = vpop.permute.xlu0 %517  ;;  %v542_v14 = vpop.permute.xlu1 %541 }
 0x16b   :  { %v521_v15 = vsel %vm519_vm4, %v516_v3, %v518_v13  ;;  %v537_v50 = vsel %vm345_vm12, %v518_v13, %v531_v47  ;;  %vm374_vm4 = vcmask 252928  }
 0x16c   :  { %576 = vmatprep.subr.bf16.mxu0 %v521_v15 }
 0x16d   :  { %577 = vmatpush1.bf16.msra.mxu0 %v520_v16 }
 0x16e   :  { %v1159_v17 = vpop.permute.xlu0 %491  ;;  %v1161_v18 = vpop.permute.xlu1 %465 }
 0x16f   :  { %v495_v19 = vsel %vm493_vm5, %v490_v8, %v1159_v17  ;;  %v469_v21 = vsel %vm467_vm6, %v464_v5, %v1161_v18  ;;  %vm556_vm5 = vcmask 998400   ;;  %vm764_vm6 = vcmask 154624  }
 0x170   :  { %578 = vmatprep.subr.bf16.mxu0 %v495_v19 }
 0x171   :  { %579 = vmatpush1.bf16.msra.mxu0 %v494_v20 }
 0x172   :  { %v540_v22 = vpop.permute.xlu0 %539  ;;  %580 = vmatprep.subr.bf16.mxu0 %v469_v21  ;;  %v499_v23 = vpop.permute.xlu1 %498 }
 0x175   :  { %581 = vmatpush1.bf16.msra.mxu0 %v468_v24 }
 0x176   :  { %v1165_v25 = vpop.permute.xlu0 %439  ;;  %v1167_v27 = vpop.permute.xlu1 %413 }
 0x177   :  { %v443_v28 = vsel %vm441_vm7, %v438_v10, %v1165_v25  ;;  %v417_v30 = vsel %vm415_vm8, %v412_v7, %v1167_v27  ;;  %vm771_vm7 = vcmask 416768   ;;  %vm784_vm8 = vcmask 568320  }
 0x178   :  { %582 = vmatprep.subr.bf16.mxu0 %v443_v28 }
 0x179   :  { %583 = vmatpush1.bf16.msra.mxu0 %v442_v29 }
 0x17a   :  { %v501_v31 = vpop.permute.xlu0 %500  ;;  %584 = vmatprep.subr.bf16.mxu0 %v417_v30  ;;  %v1171_v32 = vpop.permute.xlu1 %474  ;;  %v700_v30 = vlaneseq }
 0x17d   :  { %585 = vmatpush1.bf16.msra.mxu0 %v416_v33  ;;  %v698_v33 = vld [vmem:[%s1282_s4] sm:$0x1f]  ;;  %s964_s4 = smov 115  }
 0x17e   :  { %v1173_v34 = vpop.permute.xlu0 %387  ;;  %v1175_v35 = vpop.permute.xlu1 %361 }
 0x17f   :  { %v391_v36 = vsel %vm389_vm9, %v386_v12, %v1173_v34  ;;  %v365_v39 = vsel %vm363_vm10, %v360_v9, %v1175_v35  ;;  %vm796_vm9 = vcmask 941056  }
 0x180   :  { %586 = vmatprep.subr.bf16.mxu0 %v391_v36 }
 0x181   :  { %587 = vmatpush1.bf16.msra.mxu0 %v390_v38 }
 0x182   :  { %v473_v40 = vpop.permute.xlu0 %472  ;;  %588 = vmatprep.subr.bf16.mxu0 %v365_v39  ;;  %v1179_v41 = vpop.permute.xlu1 %448 }
 0x183   :  { %v479_v55 = vsel %vm478_vm15, %v473_v40, %v1171_v32  ;;  %v485_v61 = vsel %vm345_vm12, %v1161_v18, %v473_v40 }
 0x185   :  { %589 = vmatpush1.bf16.msra.mxu0 %v364_v42 }
 0x186   :  { %v447_v43 = vpop.permute.xlu0 %446  ;;  %590 = vmatprep.subr.bf16.mxu0 %v1075_v37  ;;  %v421_v44 = vpop.permute.xlu1 %420  ;;  %v546_v37 = vsel %vm545_vm13, %v540_v22, %v542_v14 }
 0x187   :  { %v453_v62 = vsel %vm452_vm1, %v447_v43, %v1179_v41  ;;  %v459_v2 = vsel %vm345_vm12, %v1165_v25, %v447_v43  ;;  %v433_v6 = vsel %vm345_vm12, %v1167_v27, %v421_v44 }
 0x189   :  { %591 = vmatpush1.bf16.msra.mxu0 %v1057_v26  ;;  %v505_v26 = vsel %vm504_vm14, %v499_v23, %v501_v31 }
 0x18a   :  { %v1183_v45 = vpop.permute.xlu0 %543  ;;  %v529_v46 = vpop.permute.xlu1 %528  ;;  %v511_v58 = vsel %vm345_vm12, %v1159_v17, %v505_v26 }
 0x18b   :  { %v547_v48 = vsel %vm545_vm13, %v542_v14, %v1183_v45  ;;  %v532_v49 = vsel %vm530_vm11, %v1157_v11, %v529_v46 }
 0x18c   :  { %606 = vmatprep.subr.bf16.mxu0 %v547_v48  ;;  %617 = vmatprep.subr.bf16.mxu1 %v532_v49 }
 0x18d   :  { %607 = vmatpush2.bf16.msra.mxu0 %v546_v37  ;;  %618 = vmatpush1.bf16.msra.mxu1 %v537_v50 }
 0x18e   :  { %v423_v53 = vpop.permute.xlu0 %422  ;;  %v503_v54 = vpop.permute.xlu1 %502  ;;  %658 = vmatprep.subr.bf16.mxu0 %v943_v1 }
 0x18f   :  { %v506_v57 = vsel %vm504_vm14, %v501_v31, %v503_v54  ;;  %v701_v31 = vshrl.u32 %v700_v30, 7 }
 0x190   :  { %619 = vmatprep.subr.bf16.mxu1 %v506_v57  ;;  %609 = vmatmul.mubr.bf16.vlgmr.msra.gmra.mxu0 %v1192_v52 }
 0x191   :  { %620 = vmatpush1.bf16.msra.mxu1 %v511_v58  ;;  %659 = vmatpush1.bf16.msra.mxu0 %v529_v46  ;;  %v702_v43 = vsub.s32 0, %v701_v31  ;;  %v714_v47 = vsub.s32 3, %v701_v31 }
 0x192   :  { %v395_v59 = vpop.permute.xlu0 %394  ;;  %621 = vmatprep.subr.bf16.mxu1 %v479_v55  ;;  %v397_v60 = vpop.permute.xlu1 %396  ;;  %660 = vmatprep.subr.bf16.mxu0 %v943_v1 }
 0x193   :  { %856 = vmatprep.mubr.msk.bf16.mxu0 %vm572_vm3, %v1133_v56  ;;  %v427_v56 = vsel %vm426_vm2, %v421_v44, %v423_v53  ;;  %vm400_vm3 = vcmask 244736   ;;  %v407_v11 = vsel %vm345_vm12, %v1173_v34, %v395_v59  ;;  %v703_v44 = vrot.slane %v698_v33, %v702_v43 }
 0x194   :  { %v401_v7 = vsel %vm400_vm3, %v395_v59, %v397_v60  ;;  %v715_v50 = vrot.slane %v698_v33, %v714_v47 }
 0x195   :  { %622 = vmatpush1.bf16.msra.mxu1 %v485_v61  ;;  %661 = vmatpush1.bf16.msra.mxu0 %v503_v54 }
 0x196   :  { %v371_v63 = vpop.permute.xlu0 %370  ;;  %623 = vmatprep.subr.bf16.mxu1 %v453_v62  ;;  %v369_v0 = vpop.permute.xlu1 %368  ;;  %662 = vmatprep.subr.bf16.mxu0 %v943_v1 }
 0x197   :  { %v375_v12 = vsel %vm374_vm4, %v369_v0, %v371_v63  ;;  %v381_v16 = vsel %vm345_vm12, %v1175_v35, %v369_v0  ;;  %v706_v35 = vsub.s32 1, %v701_v31 }
 0x199   :  { %624 = vmatpush1.bf16.msra.mxu1 %v459_v2  ;;  %v707_v36 = vrot.slane %v698_v33, %v706_v35 }
 0x19a   :  { %v477_v3 = vpop.permute.xlu0 %476  ;;  %625 = vmatprep.subr.bf16.mxu1 %v427_v56  ;;  %v451_v4 = vpop.permute.xlu1 %450 }
 0x19b   :  { %v480_v5 = vsel %vm478_vm15, %v1171_v32, %v477_v3  ;;  %v454_v10 = vsel %vm452_vm1, %v1179_v41, %v451_v4  ;;  %v718_v32 = vsub.s32 4, %v701_v31 }
 0x19c   :  { %663 = vmatpush1.bf16.msra.mxu0 %v480_v5 }
 0x19d   :  { %626 = vmatpush1.bf16.msra.mxu1 %v433_v6  ;;  %664 = vmatprep.subr.bf16.mxu0 %v943_v1  ;;  %v719_v34 = vrot.slane %v698_v33, %v718_v32 }
 0x19e   :  { %v340_v8 = vpop.permute.xlu0 %339  ;;  %627 = vmatprep.subr.bf16.mxu1 %v401_v7  ;;  %v342_v9 = vpop.permute.xlu1 %341 }
 0x19f   :  { %v346_v17 = vsel %vm345_vm12, %v340_v8, %v342_v9  ;;  %v352_v21 = vsel %vm345_vm12, %v1104_v51, %v340_v8 }
 0x1a0   :  { %665 = vmatpush1.bf16.msra.mxu0 %v454_v10 }
 0x1a1   :  { %628 = vmatpush1.bf16.msra.mxu1 %v407_v11  ;;  %666 = vmatprep.subr.bf16.mxu0 %v943_v1 }
 0x1a2   :  { %v425_v13 = vpop.permute.xlu0 %424  ;;  %629 = vmatprep.subr.bf16.mxu1 %v375_v12  ;;  %v399_v14 = vpop.permute.xlu1 %398 }
 0x1a3   :  { %v428_v15 = vsel %vm426_vm2, %v423_v53, %v425_v13  ;;  %v402_v20 = vsel %vm400_vm3, %v397_v60, %v399_v14 }
 0x1a4   :  { %667 = vmatpush1.bf16.msra.mxu0 %v428_v15 }
 0x1a5   :  { %630 = vmatpush1.bf16.msra.mxu1 %v381_v16  ;;  %668 = vmatprep.subr.bf16.mxu0 %v943_v1 }
 0x1a6   :  { %v551_v18 = vpop.permute.xlu0 %550  ;;  %631 = vmatprep.subr.bf16.mxu1 %v346_v17  ;;  %v344_v19 = vpop.permute.xlu1 %343 }
 0x1a7   :  { %v347_v28 = vsel %vm345_vm12, %v342_v9, %v344_v19 }
 0x1a8   :  { %669 = vmatpush1.bf16.msra.mxu0 %v402_v20 }
 0x1a9   :  { %632 = vmatpush1.bf16.msra.mxu1 %v352_v21  ;;  %670 = vmatprep.subr.bf16.mxu0 %v943_v1 }
 0x1aa   :  { %v373_v22 = vpop.permute.xlu0 %372  ;;  %v553_v23 = vpop.permute.xlu1 %552 }
 0x1ab   :  { %v376_v24 = vsel %vm374_vm4, %v371_v63, %v373_v22  ;;  %v557_v25 = vsel %vm556_vm5, %v551_v18, %v553_v23 }
 0x1ac   :  { %671 = vmatpush1.bf16.msra.mxu0 %v376_v24  ;;  %v563_v51 = vsel %vm345_vm12, %v1183_v45, %v557_v25  ;;  %v710_v45 = vsub.s32 2, %v701_v31 }
 0x1ad   :  { %672 = vmatprep.subr.bf16.mxu0 %v943_v1 }
 0x1ae   :  { %v555_v27 = vpop.permute.xlu0 %554  ;;  %v711_v48 = vrot.slane %v698_v33, %v710_v45 }
 0x1af   :  { %v558_v29 = vsel %vm556_vm5, %v553_v23, %v555_v27 }
 0x1b0   :  { %647 = vmatprep.subr.bf16.mxu1 %v558_v29  ;;  %673 = vmatpush1.bf16.msra.mxu0 %v347_v28 }
 0x1b1   :  { %648 = vmatpush2.bf16.msra.mxu1 %v563_v51  ;;  %688 = vmatprep.subr.bf16.mxu0 %v943_v1 }
 0x1b4   :  { %650 = vmatmul.mubr.bf16.vlgmr.msra.gmra.mxu1 %v1192_v52  ;;  %689 = vmatpush2.bf16.msra.mxu0 %v555_v27 }
 0x1b7   :  { %691 = vmatmul.mubr.bf16.vlgmr.msra.gmra.mxu0 %v1192_v52 }
 0x250   :  { %v610_v38 = vpop.f32.mrf.mxu0 }
 0x251   :  { %v725_v46 = vmul.f32 %v703_v44, %v610_v38 }
 0x252   :  { %v612_v39 = vpop.f32.mrf.mxu0 }
 0x253   :  { %v726_v40 = vmul.f32 %v707_v36, %v612_v39  ;;  %v739_v4 = vmul.f32 %v725_v46, %v725_v46  ;;  %v752_v15 = vpack.c.bf16 %v725_v46, %v725_v46 }
 0x254   :  { %v614_v41 = vpop.f32.mrf.mxu0 }
 0x255   :  { %v753_v1 = vpack.c.bf16 %v726_v40, %v726_v40  ;;  %v730_v49 = vadd.f32 %v726_v40, %v725_v46  ;;  %v740_v5 = vmul.f32 %v726_v40, %v726_v40 }
 0x256   :  { %v615_v42 = vpop.f32.mrf.mxu0 }
 0x257   :  { %760 = vrot.lane.b32.xlu0 %v753_v1, %s963_s2  ;;  %v744_v6 = vadd.f32 %v740_v5, %v739_v4 }
 0x274   :  { %v651_v37 = vpop.f32.mrf.mxu1 }
 0x275   :  { %v727_v52 = vmul.f32 %v711_v48, %v651_v37 }
 0x276   :  { %v653_v26 = vpop.f32.mrf.mxu1 }
 0x277   :  { %v731_v53 = vadd.f32 %v730_v49, %v727_v52  ;;  %v728_v54 = vmul.f32 %v715_v50, %v653_v26  ;;  %v692_v57 = vpop.f32.mrf.mxu0  ;;  %v754_v58 = vpack.c.bf16 %v727_v52, %v727_v52  ;;  %v741_v7 = vmul.f32 %v727_v52, %v727_v52 }
 0x278   :  { %v729_v55 = vmul.f32 %v719_v34, %v692_v57  ;;  %v655_v59 = vpop.f32.mrf.mxu1 }
 0x279   :  { %762 = vrot.lane.b32.xlu1 %v754_v58, %s963_s2  ;;  %v786_v60 = vpack.c.bf16 %v728_v54, %v728_v54  ;;  %v694_v61 = vpop.f32.mrf.mxu0  ;;  %v732_v62 = vadd.f32 %v731_v53, %v728_v54  ;;  %v742_v8 = vmul.f32 %v728_v54, %v728_v54  ;;  %v745_v9 = vadd.f32 %v744_v6, %v741_v7 }
 0x27a   :  { %v656_v63 = vpop.f32.mrf.mxu1  ;;  %v733_v0 = vsel %vm105_vm0, %v729_v55, 0.0  ;;  %v743_v10 = vmul.f32 %v729_v55, %v729_v55  ;;  %v787_v14 = vpack.c.bf16 %v729_v55, %v729_v55 }
 0x27b   :  { %792 = vrot.lane.b32.xlu0 %v786_v60, %s964_s4  ;;  %v695_v2 = vpop.f32.mrf.mxu0  ;;  %v734_v56 = vadd.f32 %v733_v0, %v732_v62  ;;  %v746_v11 = vadd.f32 %v745_v9, %v742_v8 }
 0x27c   :  { %v747_v12 = vsel %vm105_vm0, %v743_v10, 0.0  ;;  %vm737_vm0 = vcmask 7168  }
 0x27d   :  { %790 = vrot.lane.b32.xlu1 %v754_v58, %s964_s4  ;;  %v696_v3 = vpop.f32.mrf.mxu0  ;;  %v748_v13 = vadd.f32 %v747_v12, %v746_v11 }
 0x29a   :  { %749 = vadd.xlane.f32.xlu0 %v748_v13 }
 0x2a1   :  { %735 = vadd.xlane.f32.xlu1 %v734_v56 }
 0x2b0   :  { %794 = vrot.lane.b32.xlu0 %v787_v14, %s964_s4 }
 0x2b2   :  { %758 = vrot.lane.b32.xlu1 %v752_v15, %s963_s2 }
 0x2c9   :  { %v761_v16 = vpop.permute.xlu0 %760 }
 0x2eb   :  { %v763_v17 = vpop.permute.xlu1 %762 }
 0x2ec   :  { %v766_v18 = vsel %vm764_vm6, %v761_v16, %v763_v17 }
 0x2ed   :  { %v773_v19 = vsel %vm771_vm7, %v766_v18, 0  ;;  %v793_v21 = vpop.permute.xlu0 %792 }
 0x2ee   :  { %v858_v20 = vcombine.low %v773_v19, %v773_v19 }
 0x2ef   :  { %v791_v22 = vpop.permute.xlu1 %790 }
 0x2f0   :  { %785 = vst.msk [vmem:[%s1283_s5 + $0x8] sm:$0xf] %vm784_vm8, %v858_v20  ;;  %v797_v24 = vsel %vm796_vm9, %v791_v22, %v793_v21 }
 0x2f1   :  { %v800_v27 = vsel %vm764_vm6, 0, %v797_v24 }
 0x323   :  { %v750_v23 = vpop.xlane.xlu0 %749 }
 0x324   :  { %751 = vst.msk [vmem:[%s1284_s7] sm:$0xff] %vm737_vm0, %v750_v23 }
 0x327   :  { %v795_v25 = vpop.permute.xlu0 %794 }
 0x328   :  { %v798_v28 = vsel %vm796_vm9, %v793_v21, %v795_v25  ;;  %v802_v29 = vsel %vm771_vm7, %v795_v25, 0 }
 0x329   :  { %v859_v51 = vcombine.low %v800_v27, %v798_v28  ;;  %v860_v30 = vcombine.low %v802_v29, %v802_v29 }
 0x32a   :  { %v736_v31 = vpop.xlane.xlu1 %735 }
 0x32b   :  { %861 = vst [vmem:[%s1283_s5 + $0xc] sm:$0xff] %v859_v51  ;;  %862 = vst.msk [vmem:[%s1283_s5 + $0x14] sm:$0xf] %vm784_vm8, %v860_v30 }
 0x32c   :  { %738 = vst.msk [vmem:[%s1285_s6] sm:$0xff] %vm737_vm0, %v736_v31 }
 0x32e   :  { %v759_v32 = vpop.permute.xlu1 %758 }
 0x32f   :  { %v765_v33 = vsel %vm764_vm6, %v759_v32, %v761_v16  ;;  %v770_v34 = vsel %vm764_vm6, 0, %v759_v32 }
 0x330   :  { %v857_v35 = vcombine.low %v770_v34, %v765_v33 }
 0x332   :  { %783 = vst [vmem:[%s1283_s5] sm:$0xff] %v857_v35 }

</bundles_post_ra>
